<compile_context>
chip_gen: v7x
topology: tpu7x:2x2x1
jax: 0.10.0
libtpu: 0.0.40
codegen_flags: <defaults>
</compile_context>

<pallas_src>
import jax
import jax.numpy as jnp
from jax.experimental import pallas as pl
from jax.experimental.pallas import tpu as pltpu


# ---------------------------------------------------------------------------
# Kernel body
# ---------------------------------------------------------------------------
def _spatial_embed_kernel(x_ref, k_ref, o_ref, acc_ref):
    # x_ref  : (Bb, HWb, C)  feature tile    -- C lane-dense, spatial on sublanes
    # k_ref  : (F,  HWb, C)  learned-kernel tile, same minor layout
    # o_ref  : (Bb, F,  C)   output tile     -- written on the last spatial step
    # acc_ref: (Bb, F,  C)   f32 accumulator, persists across the spatial axis
    hw_step = pl.program_id(1)

    @pl.when(hw_step == 0)
    def _init():
        acc_ref[...] = jnp.zeros_like(acc_ref)

    x = x_ref[...].astype(jnp.float32)                    # (Bb, HWb, C)
    num_features = k_ref.shape[0]
    # F is small and static -> unrolled.  Per feature: VPU multiply (kernel
    # slice broadcast over the batch tile) + sublane reduction over space.
    # The MXU is intentionally unused: an (M=B) x (K=HW) x (N=F) batched
    # matmul with tiny M and N is weight-load bound and leaves the array idle.
    for f in range(num_features):
        kf = k_ref[f].astype(jnp.float32)                 # (HWb, C)
        part = jnp.sum(x * kf[None, :, :], axis=1)        # (Bb, C)
        acc_ref[:, f, :] = acc_ref[:, f, :] + part

    @pl.when(hw_step == pl.num_programs(1) - 1)
    def _finalize():
        o_ref[...] = acc_ref[...].astype(o_ref.dtype)


# ---------------------------------------------------------------------------
# Parameter relayout (one-time, init-style) and block-size selection
# ---------------------------------------------------------------------------
def prepare_kernel(kernel_hwcf: jax.Array) -> jax.Array:
    """One-time relayout of the learned parameter (H, W, C, F) -> (F, H*W, C).

    In a real setup store the parameter in this layout at init so nothing is
    transposed at runtime.  `spatial_learned_embeddings` also accepts the raw
    (H, W, C, F) parameter and calls this itself.
    """
    H, W, C, F = kernel_hwcf.shape
    return jnp.transpose(kernel_hwcf.reshape(H * W, C, F), (2, 0, 1))


def _round_up(n: int, m: int) -> int:
    return -(-n // m) * m


def _choose_blocks(B, HW, C, F, itemsize, budget_bytes):
    """Pick (b_block, hw_block) from a VMEM byte budget.

    Accounts for sublane/lane padding of every tile, double-buffered inputs /
    outputs and the in-kernel f32 temporaries.  hw_block always divides H*W
    exactly so a ragged (garbage-padded) tail block can never be summed into
    valid outputs.
    """
    c_pad = _round_up(C, 128)

    def vmem_est(bb, hb):
        hb_pad = _round_up(hb, 8)
        x_blk = bb * hb_pad * c_pad * itemsize
        k_blk = F * hb_pad * c_pad * itemsize
        o_blk = bb * _round_up(F, 8) * c_pad * itemsize
        acc = bb * _round_up(F, 8) * c_pad * 4
        tmp = 2 * bb * hb_pad * c_pad * 4          # x upcast + per-f product
        return 2 * (x_blk + k_blk + o_blk) + acc + tmp

    bb = min(B, 32)
    while True:
        for hb in range(min(HW, 4096), 0, -1):
            if HW % hb:
                continue
            if hb != HW and hb % 8:
                continue
            if vmem_est(bb, hb) <= budget_bytes:
                return bb, hb
        if bb <= 1:
            return 1, HW        # degenerate fallback; vmem_limit has headroom
        bb = max(1, bb // 2)


# ---------------------------------------------------------------------------
# Forward wrapper
# ---------------------------------------------------------------------------
def spatial_learned_embeddings(
    features: jax.Array,
    kernel: jax.Array,
    *,
    vmem_budget_bytes: int = 16 * 1024 * 1024,
) -> jax.Array:
    """features: [B, H, W, C] or [H, W, C];
    kernel: [H, W, C, F] (raw parameter) or [F, H*W, C] (prepare_kernel output).
    Returns [B, C*F] or [C*F]."""
    squeeze = features.ndim == 3
    if squeeze:
        features = features[None]
    B, H, W, C = features.shape

    if kernel.ndim == 4:
        assert kernel.shape[:3] == (H, W, C), "kernel/features shape mismatch"
        kernel = prepare_kernel(kernel)            # one-time parameter relayout
    F, HW, KC = kernel.shape
    assert (HW, KC) == (H * W, C), "kernel/features shape mismatch"

    # Free reshape (contiguous collapse) -- no HBM relayout of the features.
    x = features.reshape(B, HW, C)

    b_blk, hw_blk = _choose_blocks(B, HW, C, F, x.dtype.itemsize, vmem_budget_bytes)
    grid = (pl.cdiv(B, b_blk), HW // hw_blk)

    # NOTE: for toy problems (everything << 1 MiB) a fused jnp.einsum is
    # cheaper than any pallas_call; kept unconditional here so the kernel
    # itself is exercised.
    out_fc = pl.pallas_call(
        _spatial_embed_kernel,
        out_shape=jax.ShapeDtypeStruct((B, F, C), features.dtype),
        grid_spec=pltpu.PrefetchScalarGridSpec(
            num_scalar_prefetch=0,
            grid=grid,
            in_specs=[
                pl.BlockSpec((b_blk, hw_blk, C), lambda b, k: (b, k, 0)),
                pl.BlockSpec((F, hw_blk, C), lambda b, k: (0, k, 0)),
            ],
            out_specs=pl.BlockSpec((b_blk, F, C), lambda b, k: (b, 0, 0)),
            scratch_shapes=[pltpu.VMEM((b_blk, F, C), jnp.float32)],
        ),
        compiler_params=pltpu.CompilerParams(
            # batch axis parallel (v7x shards it across both TensorCores),
            # spatial axis is the reduction -> arbitrary, innermost.
            dimension_semantics=("parallel", "arbitrary"),
            vmem_limit_bytes=48 * 1024 * 1024,
        ),
    )(x, kernel)

    # Only wrapper-side data movement: transpose of the small (B, F, C) output
    # (B*C*F elements ~= F/HW of the feature bytes streamed by the kernel) to
    # the module's c-major (B, C*F) ordering.  The trailing reshape is a free
    # contiguous collapse.
    out = jnp.swapaxes(out_fc, 1, 2).reshape(B, C * F)
    if squeeze:
        out = out[0]
    return out


def make_kernel_param(height: int, width: int, channel: int, num_features: int,
                      key: jax.Array, dtype=jnp.float32) -> jax.Array:
    """Kaiming-normal init matching nn.init.kaiming_normal_(mode='fan_in',
    nonlinearity='linear') on a 4D tensor: gain=1, fan_in = size(1)*prod(sizes[2:])
    = width * channel * num_features."""
    fan_in = width * channel * num_features
    std = 1.0 / (fan_in ** 0.5)
    return (std * jax.random.normal(key, (height, width, channel, num_features))).astype(dtype)


if __name__ == "__main__":
    # Small shapes consistent with the module: B=2, H=W=16, C=4, num_features=5
    B, H, W, C, F = 2, 16, 16, 4, 5

    key = jax.random.PRNGKey(0)
    k_feat, k_kern = jax.random.split(key)

    features = jax.random.normal(k_feat, (B, H, W, C), dtype=jnp.float32)
    kernel = make_kernel_param(H, W, C, F, k_kern, dtype=jnp.float32)

    fwd = jax.jit(spatial_learned_embeddings)
    out = jax.block_until_ready(fwd(features, kernel))

    # Pure-JAX reference check of the exact PyTorch semantics.
    ref = jnp.einsum("bhwc,hwcf->bcf", features, kernel).reshape(B, C * F)
    assert out.shape == (B, C * F)
    assert jnp.allclose(out, ref, atol=1e-5, rtol=1e-5), "mismatch vs reference"

    # Unbatched ([H, W, C]) path check.
    out1 = jax.block_until_ready(fwd(features[0], kernel))
    assert out1.shape == (C * F,)
    assert jnp.allclose(out1, ref[0], atol=1e-5, rtol=1e-5), "mismatch vs reference (unbatched)"

    # Pre-prepared (init-time) kernel layout path check.
    kprep = prepare_kernel(kernel)
    out2 = jax.block_until_ready(fwd(features, kprep))
    assert jnp.allclose(out2, ref, atol=1e-5, rtol=1e-5), "mismatch vs reference (prepared kernel)"

    print("KERNEL_OK")
</pallas_src>

<mosaic_0001>
module attributes {stable_mosaic.version = 11 : i64} {
  func.func @_spatial_embed_kernel(%arg0: i32, %arg1: i32, %arg2: memref<2x256x4xf32, #tpu.memory_space<vmem>>, %arg3: memref<5x256x4xf32, #tpu.memory_space<vmem>>, %arg4: memref<2x5x4xf32, #tpu.memory_space<vmem>>, %arg5: memref<2x5x4xf32, #tpu.memory_space<vmem>>) attributes {dimension_semantics = [#tpu.dimension_semantics<parallel>, #tpu.dimension_semantics<arbitrary>], iteration_bounds = array<i64: 1, 1>, scalar_prefetch = 0 : i64, scratch_operands = 1 : i64, tpu.core_type = #tpu.core_type<tc>, window_params = [{transform_indices = @transform_0, window_bounds = array<i64: 2, 256, 4>}, {transform_indices = @transform_1, window_bounds = array<i64: 5, 256, 4>}, {transform_indices = @transform_2, window_bounds = array<i64: 2, 5, 4>}]} {
    %c0_i32 = arith.constant 0 : i32
    %0 = arith.cmpi eq, %arg1, %c0_i32 : i32
    %1 = arith.extui %0 : i1 to i32
    %c0_i32_0 = arith.constant 0 : i32
    %2 = arith.cmpi ne, %1, %c0_i32_0 : i32
    scf.if %2 {
      %cst_50 = arith.constant 0.000000e+00 : f32
      %67 = vector.broadcast %cst_50 : f32 to vector<2x5x4xf32>
      %c0_51 = arith.constant 0 : index
      %c0_52 = arith.constant 0 : index
      %c0_53 = arith.constant 0 : index
      %68 = vector.load %arg5[%c0_51, %c0_52, %c0_53] : memref<2x5x4xf32, #tpu.memory_space<vmem>>, vector<2x5x4xf32>
      tpu.vector_store %arg5[%c0_51, %c0_52, %c0_53], %67 {strides = array<i32>} : memref<2x5x4xf32, #tpu.memory_space<vmem>>, vector<2x5x4xf32>,
    } else {
    }
    %c0 = arith.constant 0 : index
    %c0_1 = arith.constant 0 : index
    %c0_2 = arith.constant 0 : index
    %3 = vector.load %arg2[%c0, %c0_1, %c0_2] : memref<2x256x4xf32, #tpu.memory_space<vmem>>, vector<2x256x4xf32>
    %c0_3 = arith.constant 0 : index
    %c0_4 = arith.constant 0 : index
    %c0_5 = arith.constant 0 : index
    %4 = vector.load %arg3[%c0_3, %c0_4, %c0_5] : memref<5x256x4xf32, #tpu.memory_space<vmem>>, vector<1x256x4xf32>
    %5 = vector.shape_cast %4 : vector<1x256x4xf32> to vector<256x4xf32>
    %6 = vector.shape_cast %5 : vector<256x4xf32> to vector<1x256x4xf32>
    %7 = vector.broadcast %6 : vector<1x256x4xf32> to vector<2x256x4xf32>
    %8 = arith.mulf %3, %7 : vector<2x256x4xf32>
    %cst = arith.constant dense<0.000000e+00> : vector<2x4xf32>
    %9 = vector.multi_reduction <add>, %8, %cst [1] : vector<2x256x4xf32> to vector<2x4xf32>
    %c0_6 = arith.constant 0 : index
    %c0_7 = arith.constant 0 : index
    %c0_8 = arith.constant 0 : index
    %10 = vector.load %arg5[%c0_6, %c0_7, %c0_8] : memref<2x5x4xf32, #tpu.memory_space<vmem>>, vector<2x1x4xf32>
    %11 = vector.shape_cast %10 : vector<2x1x4xf32> to vector<2x4xf32>
    %12 = arith.addf %11, %9 : vector<2x4xf32>
    %c0_9 = arith.constant 0 : index
    %c0_10 = arith.constant 0 : index
    %c0_11 = arith.constant 0 : index
    %13 = vector.load %arg5[%c0_9, %c0_10, %c0_11] : memref<2x5x4xf32, #tpu.memory_space<vmem>>, vector<2x1x4xf32>
    %14 = vector.shape_cast %13 : vector<2x1x4xf32> to vector<2x4xf32>
    %15 = vector.shape_cast %12 : vector<2x4xf32> to vector<2x1x4xf32>
    tpu.vector_store %arg5[%c0_9, %c0_10, %c0_11], %15 {strides = array<i32>} : memref<2x5x4xf32, #tpu.memory_space<vmem>>, vector<2x1x4xf32>,
    %c1 = arith.constant 1 : index
    %c0_12 = arith.constant 0 : index
    %c0_13 = arith.constant 0 : index
    %16 = vector.load %arg3[%c1, %c0_12, %c0_13] : memref<5x256x4xf32, #tpu.memory_space<vmem>>, vector<1x256x4xf32>
    %17 = vector.shape_cast %16 : vector<1x256x4xf32> to vector<256x4xf32>
    %18 = vector.shape_cast %17 : vector<256x4xf32> to vector<1x256x4xf32>
    %19 = vector.broadcast %18 : vector<1x256x4xf32> to vector<2x256x4xf32>
    %20 = arith.mulf %3, %19 : vector<2x256x4xf32>
    %cst_14 = arith.constant dense<0.000000e+00> : vector<2x4xf32>
    %21 = vector.multi_reduction <add>, %20, %cst_14 [1] : vector<2x256x4xf32> to vector<2x4xf32>
    %c0_15 = arith.constant 0 : index
    %c1_16 = arith.constant 1 : index
    %c0_17 = arith.constant 0 : index
    %22 = vector.load %arg5[%c0_15, %c1_16, %c0_17] : memref<2x5x4xf32, #tpu.memory_space<vmem>>, vector<2x1x4xf32>
    %23 = vector.shape_cast %22 : vector<2x1x4xf32> to vector<2x4xf32>
    %24 = arith.addf %23, %21 : vector<2x4xf32>
    %c0_18 = arith.constant 0 : index
    %c1_19 = arith.constant 1 : index
    %c0_20 = arith.constant 0 : index
    %25 = vector.load %arg5[%c0_18, %c1_19, %c0_20] : memref<2x5x4xf32, #tpu.memory_space<vmem>>, vector<2x1x4xf32>
    %26 = vector.shape_cast %25 : vector<2x1x4xf32> to vector<2x4xf32>
    %27 = vector.shape_cast %24 : vector<2x4xf32> to vector<2x1x4xf32>
    tpu.vector_store %arg5[%c0_18, %c1_19, %c0_20], %27 {strides = array<i32>} : memref<2x5x4xf32, #tpu.memory_space<vmem>>, vector<2x1x4xf32>,
    %c2 = arith.constant 2 : index
    %c0_21 = arith.constant 0 : index
    %c0_22 = arith.constant 0 : index
    %28 = vector.load %arg3[%c2, %c0_21, %c0_22] : memref<5x256x4xf32, #tpu.memory_space<vmem>>, vector<1x256x4xf32>
    %29 = vector.shape_cast %28 : vector<1x256x4xf32> to vector<256x4xf32>
    %30 = vector.shape_cast %29 : vector<256x4xf32> to vector<1x256x4xf32>
    %31 = vector.broadcast %30 : vector<1x256x4xf32> to vector<2x256x4xf32>
    %32 = arith.mulf %3, %31 : vector<2x256x4xf32>
    %cst_23 = arith.constant dense<0.000000e+00> : vector<2x4xf32>
    %33 = vector.multi_reduction <add>, %32, %cst_23 [1] : vector<2x256x4xf32> to vector<2x4xf32>
    %c0_24 = arith.constant 0 : index
    %c2_25 = arith.constant 2 : index
    %c0_26 = arith.constant 0 : index
    %34 = vector.load %arg5[%c0_24, %c2_25, %c0_26] : memref<2x5x4xf32, #tpu.memory_space<vmem>>, vector<2x1x4xf32>
    %35 = vector.shape_cast %34 : vector<2x1x4xf32> to vector<2x4xf32>
    %36 = arith.addf %35, %33 : vector<2x4xf32>
    %c0_27 = arith.constant 0 : index
    %c2_28 = arith.constant 2 : index
    %c0_29 = arith.constant 0 : index
    %37 = vector.load %arg5[%c0_27, %c2_28, %c0_29] : memref<2x5x4xf32, #tpu.memory_space<vmem>>, vector<2x1x4xf32>
    %38 = vector.shape_cast %37 : vector<2x1x4xf32> to vector<2x4xf32>
    %39 = vector.shape_cast %36 : vector<2x4xf32> to vector<2x1x4xf32>
    tpu.vector_store %arg5[%c0_27, %c2_28, %c0_29], %39 {strides = array<i32>} : memref<2x5x4xf32, #tpu.memory_space<vmem>>, vector<2x1x4xf32>,
    %c3 = arith.constant 3 : index
    %c0_30 = arith.constant 0 : index
    %c0_31 = arith.constant 0 : index
    %40 = vector.load %arg3[%c3, %c0_30, %c0_31] : memref<5x256x4xf32, #tpu.memory_space<vmem>>, vector<1x256x4xf32>
    %41 = vector.shape_cast %40 : vector<1x256x4xf32> to vector<256x4xf32>
    %42 = vector.shape_cast %41 : vector<256x4xf32> to vector<1x256x4xf32>
    %43 = vector.broadcast %42 : vector<1x256x4xf32> to vector<2x256x4xf32>
    %44 = arith.mulf %3, %43 : vector<2x256x4xf32>
    %cst_32 = arith.constant dense<0.000000e+00> : vector<2x4xf32>
    %45 = vector.multi_reduction <add>, %44, %cst_32 [1] : vector<2x256x4xf32> to vector<2x4xf32>
    %c0_33 = arith.constant 0 : index
    %c3_34 = arith.constant 3 : index
    %c0_35 = arith.constant 0 : index
    %46 = vector.load %arg5[%c0_33, %c3_34, %c0_35] : memref<2x5x4xf32, #tpu.memory_space<vmem>>, vector<2x1x4xf32>
    %47 = vector.shape_cast %46 : vector<2x1x4xf32> to vector<2x4xf32>
    %48 = arith.addf %47, %45 : vector<2x4xf32>
    %c0_36 = arith.constant 0 : index
    %c3_37 = arith.constant 3 : index
    %c0_38 = arith.constant 0 : index
    %49 = vector.load %arg5[%c0_36, %c3_37, %c0_38] : memref<2x5x4xf32, #tpu.memory_space<vmem>>, vector<2x1x4xf32>
    %50 = vector.shape_cast %49 : vector<2x1x4xf32> to vector<2x4xf32>
    %51 = vector.shape_cast %48 : vector<2x4xf32> to vector<2x1x4xf32>
    tpu.vector_store %arg5[%c0_36, %c3_37, %c0_38], %51 {strides = array<i32>} : memref<2x5x4xf32, #tpu.memory_space<vmem>>, vector<2x1x4xf32>,
    %c4 = arith.constant 4 : index
    %c0_39 = arith.constant 0 : index
    %c0_40 = arith.constant 0 : index
    %52 = vector.load %arg3[%c4, %c0_39, %c0_40] : memref<5x256x4xf32, #tpu.memory_space<vmem>>, vector<1x256x4xf32>
    %53 = vector.shape_cast %52 : vector<1x256x4xf32> to vector<256x4xf32>
    %54 = vector.shape_cast %53 : vector<256x4xf32> to vector<1x256x4xf32>
    %55 = vector.broadcast %54 : vector<1x256x4xf32> to vector<2x256x4xf32>
    %56 = arith.mulf %3, %55 : vector<2x256x4xf32>
    %cst_41 = arith.constant dense<0.000000e+00> : vector<2x4xf32>
    %57 = vector.multi_reduction <add>, %56, %cst_41 [1] : vector<2x256x4xf32> to vector<2x4xf32>
    %c0_42 = arith.constant 0 : index
    %c4_43 = arith.constant 4 : index
    %c0_44 = arith.constant 0 : index
    %58 = vector.load %arg5[%c0_42, %c4_43, %c0_44] : memref<2x5x4xf32, #tpu.memory_space<vmem>>, vector<2x1x4xf32>
    %59 = vector.shape_cast %58 : vector<2x1x4xf32> to vector<2x4xf32>
    %60 = arith.addf %59, %57 : vector<2x4xf32>
    %c0_45 = arith.constant 0 : index
    %c4_46 = arith.constant 4 : index
    %c0_47 = arith.constant 0 : index
    %61 = vector.load %arg5[%c0_45, %c4_46, %c0_47] : memref<2x5x4xf32, #tpu.memory_space<vmem>>, vector<2x1x4xf32>
    %62 = vector.shape_cast %61 : vector<2x1x4xf32> to vector<2x4xf32>
    %63 = vector.shape_cast %60 : vector<2x4xf32> to vector<2x1x4xf32>
    tpu.vector_store %arg5[%c0_45, %c4_46, %c0_47], %63 {strides = array<i32>} : memref<2x5x4xf32, #tpu.memory_space<vmem>>, vector<2x1x4xf32>,
    %c0_i32_48 = arith.constant 0 : i32
    %64 = arith.cmpi eq, %arg1, %c0_i32_48 : i32
    %65 = arith.extui %64 : i1 to i32
    %c0_i32_49 = arith.constant 0 : i32
    %66 = arith.cmpi ne, %65, %c0_i32_49 : i32
    scf.if %66 {
      %c0_50 = arith.constant 0 : index
      %c0_51 = arith.constant 0 : index
      %c0_52 = arith.constant 0 : index
      %67 = vector.load %arg5[%c0_50, %c0_51, %c0_52] : memref<2x5x4xf32, #tpu.memory_space<vmem>>, vector<2x5x4xf32>
      %c0_53 = arith.constant 0 : index
      %c0_54 = arith.constant 0 : index
      %c0_55 = arith.constant 0 : index
      %68 = vector.load %arg4[%c0_53, %c0_54, %c0_55] : memref<2x5x4xf32, #tpu.memory_space<vmem>>, vector<2x5x4xf32>
      tpu.vector_store %arg4[%c0_53, %c0_54, %c0_55], %67 {strides = array<i32>} : memref<2x5x4xf32, #tpu.memory_space<vmem>>, vector<2x5x4xf32>,
    } else {
    }
    return
  }
  func.func @transform_0(%arg0: i32, %arg1: i32) -> (i32, i32, i32) {
    %c0_i32 = arith.constant 0 : i32
    %c0_i32_0 = arith.constant 0 : i32
    return %arg0, %arg1, %c0_i32 : i32, i32, i32
  }
  func.func @transform_1(%arg0: i32, %arg1: i32) -> (i32, i32, i32) {
    %c0_i32 = arith.constant 0 : i32
    %c0_i32_0 = arith.constant 0 : i32
    %c0_i32_1 = arith.constant 0 : i32
    return %c0_i32, %arg1, %c0_i32_0 : i32, i32, i32
  }
  func.func @transform_2(%arg0: i32, %arg1: i32) -> (i32, i32, i32) {
    %c0_i32 = arith.constant 0 : i32
    %c0_i32_0 = arith.constant 0 : i32
    %c0_i32_1 = arith.constant 0 : i32
    return %arg0, %c0_i32, %c0_i32_0 : i32, i32, i32
  }
}

</mosaic_0001>

<bundles_post_ra>
// kernel: spatial_learned_embeddings.1
= control target key start
LH: loop header
LB: loop body
LE: loop exit
PB: predicated region body
PF: predicated region fallthrough
CT: control target
= control target key end

     0   :  { %vm15_vm0 = vcmask 28672   ;;  %v1501_v0 = vmov 0.0   ;;  %vm178_vm1 = vcmask 31744   ;;  %vm321_vm2 = vcmask 24576   ;;  %s4058_s0 = inlined_call_operand.vmem [shape: f32[2,256,4], index: 0, kind: input, shape index: {}]   ;;  %s4059_s1 = inlined_call_operand.vmem [shape: f32[5,256,4], index: 1, kind: input, shape index: {}]   ;;  %s4060_s2 = inlined_call_operand.vmem [shape: f32[2,5,4], index: 2, kind: output, shape index: {}]  }
   0x1   :  { %16 = vst.msk [vmem:[#allocation2] sm:$0x1f] %vm15_vm0, %v1501_v0  ;;  %17 = vst.msk [vmem:[#allocation2 + $0x8] sm:$0x1f] %vm15_vm0, %v1501_v0  ;;  %v1522_v1 = vld [vmem:[%s4058_s0] sm:$0xff]  ;;  %v1527_v2 = vld [vmem:[%s4058_s0 + $0x8] sm:$0xff] }
   0x2   :  { %v1532_v3 = vld [vmem:[%s4058_s0 + $0x10] sm:$0xff]  ;;  %v82_v4 = vld [vmem:[%s4059_s1] sm:$0xff]  ;;  %v83_v5 = vld [vmem:[%s4059_s1 + $0x8] sm:$0xff] }
   0x3   :  { %v84_v6 = vld [vmem:[%s4059_s1 + $0x10] sm:$0xff]  ;;  %v1546_v7 = vld [vmem:[%s4058_s0 + $0x18] sm:$0xff]  ;;  %v114_v9 = vmul.f32 %v82_v4, %v1522_v1  ;;  %v115_v10 = vmul.f32 %v83_v5, %v1527_v2  ;;  %v1557_v12 = vld [vmem:[%s4058_s0 + $0x20] sm:$0xff] }
   0x4   :  { %4185 = vst [vmem:[#allocation3_spill] sm:$0xff] %v1546_v7  ;;  %v85_v8 = vld [vmem:[%s4059_s1 + $0x18] sm:$0xff]  ;;  %v116_v11 = vmul.f32 %v84_v6, %v1532_v3  ;;  %4186 = vst [vmem:[#allocation4_spill] sm:$0xff] %v1557_v12  ;;  %v86_v13 = vld [vmem:[%s4059_s1 + $0x20] sm:$0xff] }
   0x5   :  { %v117_v14 = vmul.f32 %v85_v8, %v1546_v7  ;;  %v1566_v15 = vld [vmem:[%s4058_s0 + $0x28] sm:$0xff]  ;;  %v1576_v17 = vld [vmem:[%s4058_s0 + $0x30] sm:$0xff]  ;;  %v118_v18 = vmul.f32 %v86_v13, %v1557_v12  ;;  %v179_v19 = vsel %vm178_vm1, %v114_v9, 0.0  ;;  %v180_v20 = vsel %vm178_vm1, %v115_v10, 0.0  ;;  %v1585_v22 = vld [vmem:[%s4058_s0 + $0x38] sm:$0xff] }
   0x6   :  { %4187 = vst [vmem:[#allocation5_spill] sm:$0xff] %v1566_v15  ;;  %v1571_v16 = vld [vmem:[%s4059_s1 + $0x28] sm:$0xff]  ;;  %4188 = vst [vmem:[#allocation6_spill] sm:$0xff] %v1576_v17  ;;  %v182_v21 = vsel %vm178_vm1, %v116_v11, 0.0  ;;  %v1590_v23 = vld [vmem:[%s4058_s0 + $0x40] sm:$0xff]  ;;  %v181_v25 = vadd.f32 %v180_v20, %v179_v19 }
   0x7   :  { %4189 = vst [vmem:[#allocation7_spill] sm:$0xff] %v1585_v22  ;;  %4190 = vst [vmem:[#allocation8_spill] sm:$0xff] %v1590_v23  ;;  %v1595_v24 = vld [vmem:[%s4059_s1 + $0x30] sm:$0xff]  ;;  %v1600_v26 = vld [vmem:[%s4058_s0 + $0x48] sm:$0xff]  ;;  %v119_v31 = vmul.f32 %v1571_v16, %v1566_v15  ;;  %v184_v32 = vsel %vm178_vm1, %v117_v14, 0.0  ;;  %v186_v44 = vsel %vm178_vm1, %v118_v18, 0.0 }
   0x8   :  { %4191 = vst [vmem:[#allocation9_spill] sm:$0xff] %v1600_v26  ;;  %v1605_v27 = vld [vmem:[%s4058_s0 + $0x50] sm:$0xff]  ;;  %v1610_v28 = vld [vmem:[%s4058_s0 + $0x100] sm:$0xff]  ;;  %v1615_v29 = vld [vmem:[%s4058_s0 + $0x108] sm:$0xff]  ;;  %v183_v39 = vadd.f32 %v182_v21, %v181_v25  ;;  %v120_v43 = vmul.f32 %v1595_v24, %v1576_v17 }
   0x9   :  { %4192 = vst [vmem:[#allocation10_spill] sm:$0xff] %v1605_v27  ;;  %4193 = vst [vmem:[#allocation11_spill] sm:$0xff] %v1610_v28  ;;  %v1620_v30 = vld [vmem:[%s4058_s0 + $0x110] sm:$0xff]  ;;  %v1628_v33 = vld [vmem:[%s4058_s0 + $0x58] sm:$0xff]  ;;  %v146_v48 = vmul.f32 %v82_v4, %v1610_v28  ;;  %v147_v49 = vmul.f32 %v83_v5, %v1615_v29  ;;  %v188_v58 = vsel %vm178_vm1, %v119_v31, 0.0 }
   0xa   :  { %4194 = vst [vmem:[#allocation12_spill] sm:$0xff] %v1615_v29  ;;  %4195 = vst [vmem:[#allocation13_spill] sm:$0xff] %v1620_v30  ;;  %v1633_v34 = vld [vmem:[%s4058_s0 + $0x60] sm:$0xff]  ;;  %v1638_v35 = vld [vmem:[%s4058_s0 + $0x68] sm:$0xff]  ;;  %v148_v50 = vmul.f32 %v84_v6, %v1620_v30  ;;  %v185_v51 = vadd.f32 %v184_v32, %v183_v39  ;;  %v190_v14 = vsel %vm178_vm1, %v120_v43, 0.0 }
   0xb   :  { %4196 = vst [vmem:[#allocation14_spill] sm:$0xff] %v1628_v33  ;;  %4197 = vst [vmem:[#allocation15_spill] sm:$0xff] %v1633_v34  ;;  %v1643_v36 = vld [vmem:[%s4058_s0 + $0x118] sm:$0xff]  ;;  %v1653_v38 = vld [vmem:[%s4059_s1 + $0x40] sm:$0xff]  ;;  %v248_v25 = vsel %vm178_vm1, %v146_v48, 0.0  ;;  %v249_v31 = vsel %vm178_vm1, %v147_v49, 0.0 }
   0xc   :  { %4198 = vst [vmem:[#allocation16_spill] sm:$0xff] %v1638_v35  ;;  %4199 = vst [vmem:[#allocation17_spill] sm:$0xff] %v1643_v36  ;;  %v1648_v37 = vld [vmem:[%s4059_s1 + $0x38] sm:$0xff]  ;;  %v1658_v40 = vld [vmem:[%s4058_s0 + $0x120] sm:$0xff]  ;;  %v122_v56 = vmul.f32 %v1653_v38, %v1590_v23  ;;  %v149_v57 = vmul.f32 %v85_v8, %v1643_v36  ;;  %v187_v4 = vadd.f32 %v186_v44, %v185_v51  ;;  %v251_v32 = vsel %vm178_vm1, %v148_v50, 0.0 }
   0xd   :  { %4200 = vst [vmem:[#allocation18_spill] sm:$0xff] %v1658_v40  ;;  %v1663_v41 = vld [vmem:[%s4059_s1 + $0x48] sm:$0xff]  ;;  %v1668_v42 = vld [vmem:[%s4059_s1 + $0x50] sm:$0xff]  ;;  %v1676_v45 = vld [vmem:[%s4059_s1 + $0x58] sm:$0xff]  ;;  %v121_v55 = vmul.f32 %v1648_v37, %v1585_v22  ;;  %v150_v0 = vmul.f32 %v86_v13, %v1658_v40 }
   0xe   :  { %v1681_v46 = vld [vmem:[%s4059_s1 + $0x60] sm:$0xff]  ;;  %v1686_v47 = vld [vmem:[%s4059_s1 + $0x68] sm:$0xff]  ;;  %v1694_v52 = vld [vmem:[%s4058_s0 + $0x70] sm:$0xff]  ;;  %v123_v62 = vmul.f32 %v1663_v41, %v1600_v26  ;;  %v1731_v63 = vmul.f32 %v1668_v42, %v1605_v27  ;;  %v1756_v10 = vmul.f32 %v1676_v45, %v1628_v33  ;;  %v189_v21 = vadd.f32 %v188_v58, %v187_v4 }
   0xf   :  { %4201 = vst [vmem:[#allocation19_spill] sm:$0xff] %v1694_v52  ;;  %v1699_v53 = vld [vmem:[%s4058_s0 + $0x78] sm:$0xff]  ;;  %v1704_v54 = vld [vmem:[%s4058_s0 + $0x80] sm:$0xff]  ;;  %v1715_v59 = vld [vmem:[%s4058_s0 + $0x88] sm:$0xff]  ;;  %v1760_v11 = vmul.f32 %v1681_v46, %v1633_v34  ;;  %v1764_v13 = vmul.f32 %v1686_v47, %v1638_v35  ;;  %v192_v51 = vsel %vm178_vm1, %v121_v55, 0.0  ;;  %v250_v58 = vadd.f32 %v249_v31, %v248_v25 }
  0x10   :  { %4202 = vst [vmem:[#allocation20_spill] sm:$0xff] %v1699_v53  ;;  %4203 = vst [vmem:[#allocation21_spill] sm:$0xff] %v1704_v54  ;;  %v1720_v60 = vld [vmem:[%s4058_s0 + $0x128] sm:$0xff]  ;;  %v1725_v61 = vld [vmem:[%s4059_s1 + $0x70] sm:$0xff]  ;;  %v191_v25 = vadd.f32 %v190_v14, %v189_v21  ;;  %v253_v31 = vsel %vm178_vm1, %v149_v57, 0.0 }
  0x11   :  { %4204 = vst [vmem:[#allocation22_spill] sm:$0xff] %v1715_v59  ;;  %4205 = vst [vmem:[#allocation23_spill] sm:$0xff] %v1720_v60  ;;  %v1737_v5 = vld [vmem:[%s4058_s0 + $0x90] sm:$0xff]  ;;  %v1742_v6 = vld [vmem:[%s4058_s0 + $0x98] sm:$0xff]  ;;  %v1807_v49 = vmul.f32 %v1725_v61, %v1694_v52  ;;  %v151_v50 = vmul.f32 %v1571_v16, %v1720_v60  ;;  %v252_v40 = vadd.f32 %v251_v32, %v250_v58  ;;  %v255_v58 = vsel %vm178_vm1, %v150_v0, 0.0 }
  0x12   :  { %4206 = vst [vmem:[#allocation24_spill] sm:$0xff] %v1737_v5  ;;  %4207 = vst [vmem:[#allocation25_spill] sm:$0xff] %v1742_v6  ;;  %v1747_v8 = vld [vmem:[%s4059_s1 + $0x78] sm:$0xff]  ;;  %v1752_v9 = vld [vmem:[%s4059_s1 + $0x80] sm:$0xff]  ;;  %v193_v32 = vadd.f32 %v192_v51, %v191_v25  ;;  %v196_v25 = vsel %vm178_vm1, %v123_v62, 0.0 }
  0x13   :  { %v1770_v18 = vld [vmem:[%s4058_s0 + $0xa0] sm:$0xff]  ;;  %v1775_v19 = vld [vmem:[%s4058_s0 + $0x130] sm:$0xff]  ;;  %v1780_v20 = vld [vmem:[%s4059_s1 + $0x88] sm:$0xff]  ;;  %v1829_v16 = vmul.f32 %v1747_v8, %v1699_v53  ;;  %v1833_v55 = vmul.f32 %v1752_v9, %v1704_v54  ;;  %v194_v54 = vsel %vm178_vm1, %v122_v56, 0.0 }
  0x14   :  { %4208 = vst [vmem:[#allocation26_spill] sm:$0xff] %v1770_v18  ;;  %4209 = vst [vmem:[#allocation27_spill] sm:$0xff] %v1775_v19  ;;  %v1788_v39 = vld [vmem:[%s4058_s0 + $0xa8] sm:$0xff]  ;;  %v1793_v43 = vld [vmem:[%s4058_s0 + $0xb0] sm:$0xff]  ;;  %v1858_v57 = vmul.f32 %v1780_v20, %v1715_v59  ;;  %v152_v21 = vmul.f32 %v1595_v24, %v1775_v19  ;;  %v195_v62 = vadd.f32 %v194_v54, %v193_v32  ;;  %v198_v32 = vsel %vm178_vm1, %v1731_v63, 0.0 }
  0x15   :  { %4210 = vst [vmem:[#allocation28_spill] sm:$0xff] %v1788_v39  ;;  %4211 = vst [vmem:[#allocation29_spill] sm:$0xff] %v1793_v43  ;;  %v1798_v44 = vld [vmem:[%s4059_s1 + $0x90] sm:$0xff]  ;;  %v1803_v48 = vld [vmem:[%s4059_s1 + $0x98] sm:$0xff] }
  0x16   :  { %v1815_v4 = vld [vmem:[%s4058_s0 + $0xb8] sm:$0xff]  ;;  %v1825_v52 = vld [vmem:[%s4059_s1 + $0xa0] sm:$0xff]  ;;  %v1844_v34 = vld [vmem:[%s4058_s0 + $0xc8] sm:$0xff]  ;;  %v1880_v24 = vmul.f32 %v1798_v44, %v1737_v5  ;;  %v1884_v56 = vmul.f32 %v1803_v48, %v1742_v6  ;;  %v254_v6 = vadd.f32 %v253_v31, %v252_v40  ;;  %v257_v31 = vsel %vm178_vm1, %v151_v50, 0.0 }
  0x17   :  { %4212 = vst [vmem:[#allocation30_spill] sm:$0xff] %v1815_v4  ;;  %v1820_v35 = vld [vmem:[%s4058_s0 + $0x138] sm:$0xff]  ;;  %v1839_v60 = vld [vmem:[%s4058_s0 + $0xc0] sm:$0xff]  ;;  %4215 = vst [vmem:[#allocation33_spill] sm:$0xff] %v1844_v34  ;;  %v1904_v51 = vmul.f32 %v1825_v52, %v1770_v18 }
  0x18   :  { %4213 = vst [vmem:[#allocation31_spill] sm:$0xff] %v1820_v35  ;;  %4214 = vst [vmem:[#allocation32_spill] sm:$0xff] %v1839_v60  ;;  %v1849_v53 = vld [vmem:[%s4059_s1 + $0xa8] sm:$0xff]  ;;  %v1854_v14 = vld [vmem:[%s4059_s1 + $0xb0] sm:$0xff]  ;;  %v153_v0 = vmul.f32 %v1648_v37, %v1820_v35 }
  0x19   :  { %v1866_v36 = vld [vmem:[%s4058_s0 + $0xd0] sm:$0xff]  ;;  %v1871_v33 = vld [vmem:[%s4058_s0 + $0x140] sm:$0xff]  ;;  %v1876_v59 = vld [vmem:[%s4059_s1 + $0xb8] sm:$0xff]  ;;  %v1926_v37 = vmul.f32 %v1849_v53, %v1788_v39  ;;  %v1930_v40 = vmul.f32 %v1854_v14, %v1793_v43  ;;  %v256_v43 = vadd.f32 %v255_v58, %v254_v6  ;;  %v197_v6 = vadd.f32 %v196_v25, %v195_v62 }
  0x1a   :  { %4216 = vst [vmem:[#allocation34_spill] sm:$0xff] %v1866_v36  ;;  %4217 = vst [vmem:[#allocation35_spill] sm:$0xff] %v1871_v33  ;;  %v1890_v19 = vld [vmem:[%s4058_s0 + $0xd8] sm:$0xff]  ;;  %v1895_v27 = vld [vmem:[%s4059_s1 + $0xc0] sm:$0xff]  ;;  %v1950_v54 = vmul.f32 %v1876_v59, %v1815_v4  ;;  %v154_v50 = vmul.f32 %v1653_v38, %v1871_v33  ;;  %v259_v58 = vsel %vm178_vm1, %v152_v21, 0.0  ;;  %v200_v62 = vsel %vm178_vm1, %v1756_v10, 0.0 }
  0x1b   :  { %4218 = vst [vmem:[#allocation36_spill] sm:$0xff] %v1890_v19  ;;  %v1900_v5 = vld [vmem:[%s4059_s1 + $0xc8] sm:$0xff]  ;;  %v1912_v26 = vld [vmem:[%s4058_s0 + $0xe0] sm:$0xff]  ;;  %v1922_v18 = vld [vmem:[%s4059_s1 + $0xd0] sm:$0xff]  ;;  %v1973_v38 = vmul.f32 %v1895_v27, %v1839_v60  ;;  %v199_v10 = vadd.f32 %v198_v32, %v197_v6 }
  0x1c   :  { %4219 = vst [vmem:[#allocation37_spill] sm:$0xff] %v1912_v26  ;;  %v1917_v30 = vld [vmem:[%s4058_s0 + $0x148] sm:$0xff]  ;;  %v1941_v29 = vld [vmem:[%s4059_s1 + $0xd8] sm:$0xff]  ;;  %v1946_v39 = vld [vmem:[%s4059_s1 + $0xe0] sm:$0xff]  ;;  %v1977_v63 = vmul.f32 %v1900_v5, %v1844_v34  ;;  %v1997_v25 = vmul.f32 %v1922_v18, %v1866_v36  ;;  %v258_v34 = vadd.f32 %v257_v31, %v256_v43  ;;  %v261_v43 = vsel %vm178_vm1, %v153_v0, 0.0 }
  0x1d   :  { %4220 = vst [vmem:[#allocation38_spill] sm:$0xff] %v1917_v30  ;;  %v1936_v35 = vld [vmem:[%s4058_s0 + $0xe8] sm:$0xff]  ;;  %v1959_v28 = vld [vmem:[%s4058_s0 + $0xf0] sm:$0xff]  ;;  %v1983_v33 = vld [vmem:[%s4058_s0 + $0xf8] sm:$0xff]  ;;  %v155_v21 = vmul.f32 %v1663_v41, %v1917_v30  ;;  %v2015_v36 = vmul.f32 %v1941_v29, %v1890_v19  ;;  %v2019_v41 = vmul.f32 %v1946_v39, %v1912_v26  ;;  %v202_v0 = vsel %vm178_vm1, %v1760_v11, 0.0 }
  0x1e   :  { %4221 = vst [vmem:[#allocation39_spill] sm:$0xff] %v1936_v35  ;;  %4222 = vst [vmem:[#allocation40_spill] sm:$0xff] %v1959_v28  ;;  %v1964_v23 = vld [vmem:[%s4058_s0 + $0x150] sm:$0xff]  ;;  %v1969_v4 = vld [vmem:[%s4059_s1 + $0xe8] sm:$0xff]  ;;  %v260_v32 = vadd.f32 %v259_v58, %v258_v34  ;;  %v201_v11 = vadd.f32 %v200_v62, %v199_v10  ;;  %v263_v34 = vsel %vm178_vm1, %v154_v50, 0.0  ;;  %v204_v62 = vsel %vm178_vm1, %v1764_v13, 0.0 }
  0x1f   :  { %4223 = vst [vmem:[#allocation41_spill] sm:$0xff] %v1964_v23  ;;  %4224 = vst [vmem:[#allocation42_spill] sm:$0xff] %v1983_v33  ;;  %v1988_v22 = vld [vmem:[%s4059_s1 + $0xf0] sm:$0xff]  ;;  %v1993_v60 = vld [vmem:[%s4059_s1 + $0xf8] sm:$0xff]  ;;  %v2034_v19 = vmul.f32 %v1969_v4, %v1936_v35  ;;  %v156_v26 = vmul.f32 %v1668_v42, %v1964_v23  ;;  %v265_v13 = vsel %vm178_vm1, %v155_v21, 0.0 }
  0x20   :  { %v2006_v17 = vld [vmem:[%s4058_s0 + $0x158] sm:$0xff]  ;;  %v2011_v15 = vld [vmem:[%s4058_s0 + $0x160] sm:$0xff]  ;;  %v2025_v31 = vld [vmem:[%s4058_s0 + $0x168] sm:$0xff]  ;;  %v2052_v35 = vmul.f32 %v1988_v22, %v1959_v28  ;;  %v2056_v42 = vmul.f32 %v1993_v60, %v1983_v33  ;;  %v262_v50 = vadd.f32 %v261_v43, %v260_v32 }
  0x21   :  { %4225 = vst [vmem:[#allocation43_spill] sm:$0xff] %v2006_v17  ;;  %4226 = vst [vmem:[#allocation44_spill] sm:$0xff] %v2011_v15  ;;  %v2030_v30 = vld [vmem:[%s4058_s0 + $0x170] sm:$0xff]  ;;  %v2043_v6 = vld [vmem:[%s4058_s0 + $0x178] sm:$0xff]  ;;  %v157_v28 = vmul.f32 %v1676_v45, %v2006_v17  ;;  %v158_v33 = vmul.f32 %v1681_v46, %v2011_v15  ;;  %v159_v45 = vmul.f32 %v1686_v47, %v2025_v31 }
  0x22   :  { %v2048_v12 = vld [vmem:[%s4058_s0 + $0x180] sm:$0xff]  ;;  %v2062_v58 = vld [vmem:[%s4058_s0 + $0x188] sm:$0xff]  ;;  %v2067_v23 = vld [vmem:[%s4058_s0 + $0x190] sm:$0xff]  ;;  %v160_v46 = vmul.f32 %v1725_v61, %v2030_v30  ;;  %v203_v15 = vadd.f32 %v202_v0, %v201_v11  ;;  %v161_v17 = vmul.f32 %v1747_v8, %v2043_v6  ;;  %v206_v61 = vsel %vm178_vm1, %v1807_v49, 0.0 }
  0x23   :  { %4227 = vst [vmem:[#allocation45_spill] sm:$0xff] %v2048_v12  ;;  %4228 = vst [vmem:[#allocation46_spill] sm:$0xff] %v2067_v23  ;;  %v2078_v10 = vld [vmem:[%s4058_s0 + $0x198] sm:$0xff]  ;;  %v2083_v7 = vld [vmem:[%s4058_s0 + $0x1a0] sm:$0xff]  ;;  %v162_v47 = vmul.f32 %v1752_v9, %v2048_v12  ;;  %v264_v21 = vadd.f32 %v263_v34, %v262_v50  ;;  %v2118_v8 = vmul.f32 %v1780_v20, %v2062_v58  ;;  %v267_v34 = vsel %vm178_vm1, %v156_v26, 0.0 }
  0x24   :  { %4229 = vst [vmem:[#allocation47_spill] sm:$0xff] %v2083_v7  ;;  %v2093_v43 = vld [vmem:[%s4058_s0 + $0x1a8] sm:$0xff]  ;;  %v2098_v32 = vld [vmem:[%s4058_s0 + $0x1b0] sm:$0xff]  ;;  %v2109_v0 = vld [vmem:[%s4058_s0 + $0x1b8] sm:$0xff]  ;;  %v2122_v9 = vmul.f32 %v1798_v44, %v2067_v23  ;;  %v205_v49 = vadd.f32 %v204_v62, %v203_v15  ;;  %v2137_v20 = vmul.f32 %v1803_v48, %v2078_v10  ;;  %v2141_v44 = vmul.f32 %v1825_v52, %v2083_v7 }
  0x25   :  { %4230 = vst [vmem:[#allocation48_spill] sm:$0xff] %v2098_v32  ;;  %4231 = vst [vmem:[#allocation49_spill] sm:$0xff] %v2109_v0  ;;  %v2114_v11 = vld [vmem:[%s4058_s0 + $0x1c0] sm:$0xff]  ;;  %v2128_v50 = vld [vmem:[%s4058_s0 + $0x1c8] sm:$0xff]  ;;  %v208_v15 = vsel %vm178_vm1, %v1829_v16, 0.0  ;;  %v266_v26 = vadd.f32 %v265_v13, %v264_v21  ;;  %v2157_v48 = vmul.f32 %v1849_v53, %v2093_v43  ;;  %v2161_v52 = vmul.f32 %v1854_v14, %v2098_v32 }
  0x26   :  { %4232 = vst [vmem:[#allocation50_spill] sm:$0xff] %v2128_v50  ;;  %v2133_v12 = vld [vmem:[%s4058_s0 + $0x1d0] sm:$0xff]  ;;  %v2148_v62 = vld [vmem:[%s4058_s0 + $0x1d8] sm:$0xff]  ;;  %v2153_v23 = vld [vmem:[%s4058_s0 + $0x1e0] sm:$0xff]  ;;  %v207_v16 = vadd.f32 %v206_v61, %v205_v49  ;;  %v269_v13 = vsel %vm178_vm1, %v157_v28, 0.0  ;;  %v2176_v53 = vmul.f32 %v1876_v59, %v2109_v0  ;;  %v2180_v14 = vmul.f32 %v1895_v27, %v2114_v11 }
  0x27   :  { %v2167_v21 = vld [vmem:[%s4058_s0 + $0x1e8] sm:$0xff]  ;;  %v2172_v7 = vld [vmem:[%s4058_s0 + $0x1f0] sm:$0xff]  ;;  %v210_v28 = vsel %vm178_vm1, %v1833_v55, 0.0  ;;  %v268_v61 = vadd.f32 %v267_v34, %v266_v26  ;;  %v2187_v49 = vld [vmem:[%s4058_s0 + $0x1f8] sm:$0xff]  ;;  %v2191_v32 = vmul.f32 %v1900_v5, %v2128_v50  ;;  %v2195_v59 = vmul.f32 %v1922_v18, %v2133_v12 }
  0x28   :  { %4233 = vst [vmem:[#allocation51_spill] sm:$0xff] %v2172_v7  ;;  %4234 = vst [vmem:[#allocation52_spill] sm:$0xff] %v2187_v49  ;;  %v209_v0 = vadd.f32 %v208_v15, %v207_v16  ;;  %v271_v27 = vsel %vm178_vm1, %v158_v33, 0.0  ;;  %v2200_v55 = vmul.f32 %v1941_v29, %v2148_v62  ;;  %v2204_v34 = vmul.f32 %v1946_v39, %v2153_v23 }
  0x29   :  { %v212_v26 = vsel %vm178_vm1, %v1858_v57, 0.0  ;;  %v270_v5 = vadd.f32 %v269_v13, %v268_v61  ;;  %v2210_v50 = vmul.f32 %v1969_v4, %v2167_v21  ;;  %v2214_v18 = vmul.f32 %v1988_v22, %v2172_v7  ;;  %v4245_v7 = vld [vmem:[#allocation10_spill] sm:$0xff] }
  0x2a   :  { %v211_v33 = vadd.f32 %v210_v28, %v209_v0  ;;  %v273_v29 = vsel %vm178_vm1, %v159_v45, 0.0  ;;  %v2219_v15 = vmul.f32 %v1993_v60, %v2187_v49  ;;  %v214_v39 = vsel %vm178_vm1, %v1880_v24, 0.0  ;;  %v2239_v28 = vld [vmem:[%s4059_s1 + $0x100] sm:$0xff] }
  0x2b   :  { %v216_v57 = vsel %vm178_vm1, %v1884_v56, 0.0  ;;  %v272_v16 = vadd.f32 %v271_v27, %v270_v5  ;;  %v218_v13 = vsel %vm178_vm1, %v1904_v51, 0.0  ;;  %v220_v22 = vsel %vm178_vm1, %v1926_v37, 0.0  ;;  %v2244_v51 = vld [vmem:[%s4059_s1 + $0x108] sm:$0xff]  ;;  %v2249_v37 = vld [vmem:[%s4059_s1 + $0x110] sm:$0xff] }
  0x2c   :  { %v213_v4 = vadd.f32 %v212_v26, %v211_v33  ;;  %v275_v45 = vsel %vm178_vm1, %v160_v46, 0.0  ;;  %v222_v60 = vsel %vm178_vm1, %v1930_v40, 0.0  ;;  %v224_v0 = vsel %vm178_vm1, %v1950_v54, 0.0 }
  0x2d   :  { %v226_v24 = vsel %vm178_vm1, %v1973_v38, 0.0  ;;  %v274_v56 = vadd.f32 %v273_v29, %v272_v16  ;;  %v2253_v54 = vsel %vm178_vm1, %v1977_v63, 0.0  ;;  %v2257_v38 = vsel %vm178_vm1, %v1997_v25, 0.0  ;;  %v2272_v63 = vld [vmem:[%s4059_s1 + $0x118] sm:$0xff] }
  0x2e   :  { %v215_v40 = vadd.f32 %v214_v39, %v213_v4  ;;  %v277_v46 = vsel %vm178_vm1, %v161_v17, 0.0  ;;  %v2262_v61 = vsel %vm178_vm1, %v2015_v36, 0.0  ;;  %v2266_v27 = vsel %vm178_vm1, %v2019_v41, 0.0  ;;  %v2277_v17 = vld [vmem:[%s4059_s1 + $0x120] sm:$0xff] }
  0x2f   :  { %v276_v26 = vadd.f32 %v275_v45, %v274_v56  ;;  %v279_v5 = vsel %vm178_vm1, %v162_v47, 0.0  ;;  %v357_v36 = vmul.f32 %v2239_v28, %v1522_v1  ;;  %v358_v41 = vmul.f32 %v2244_v51, %v1527_v2  ;;  %v4235_v56 = vld [vmem:[#allocation3_spill] sm:$0xff] }
  0x30   :  { %v217_v25 = vadd.f32 %v216_v57, %v215_v40  ;;  %v359_v47 = vmul.f32 %v2249_v37, %v1532_v3  ;;  %v2287_v33 = vsel %vm178_vm1, %v2034_v19, 0.0  ;;  %v2291_v29 = vsel %vm178_vm1, %v2052_v35, 0.0 }
  0x31   :  { %v2295_v39 = vsel %vm178_vm1, %v2056_v42, 0.0  ;;  %v278_v57 = vadd.f32 %v277_v46, %v276_v26  ;;  %v281_v4 = vsel %vm178_vm1, %v2118_v8, 0.0  ;;  %v283_v45 = vsel %vm178_vm1, %v2122_v9, 0.0  ;;  %v2310_v42 = vld [vmem:[%s4059_s1 + $0x128] sm:$0xff] }
  0x32   :  { %v219_v16 = vadd.f32 %v218_v13, %v217_v25  ;;  %v360_v19 = vmul.f32 %v2272_v63, %v4235_v56  ;;  %v285_v35 = vsel %vm178_vm1, %v2137_v20, 0.0  ;;  %v287_v49 = vsel %vm178_vm1, %v2141_v44, 0.0  ;;  %v4236_v13 = vld [vmem:[#allocation4_spill] sm:$0xff] }
  0x33   :  { %v280_v40 = vadd.f32 %v279_v5, %v278_v57  ;;  %v361_v8 = vmul.f32 %v2277_v17, %v4236_v13  ;;  %v421_v9 = vsel %vm178_vm1, %v357_v36, 0.0  ;;  %v422_v26 = vsel %vm178_vm1, %v358_v41, 0.0  ;;  %v2324_v57 = vld [vmem:[%s4059_s1 + $0x130] sm:$0xff]  ;;  %v4237_v41 = vld [vmem:[#allocation5_spill] sm:$0xff] }
  0x34   :  { %v221_v46 = vadd.f32 %v220_v22, %v219_v16  ;;  %v424_v5 = vsel %vm178_vm1, %v359_v47, 0.0  ;;  %v289_v20 = vsel %vm178_vm1, %v2157_v48, 0.0  ;;  %v291_v44 = vsel %vm178_vm1, %v2161_v52, 0.0 }
  0x35   :  { %v282_v25 = vadd.f32 %v281_v4, %v280_v40  ;;  %v423_v13 = vadd.f32 %v422_v26, %v421_v9  ;;  %v293_v36 = vsel %vm178_vm1, %v2176_v53, 0.0  ;;  %v362_v47 = vmul.f32 %v2310_v42, %v4237_v41  ;;  %v2338_v40 = vld [vmem:[%s4059_s1 + $0x138] sm:$0xff]  ;;  %v4238_v9 = vld [vmem:[#allocation6_spill] sm:$0xff]  ;;  %v4244_v41 = vld [vmem:[#allocation9_spill] sm:$0xff] }
  0x36   :  { %v223_v22 = vadd.f32 %v222_v60, %v221_v46  ;;  %v426_v16 = vsel %vm178_vm1, %v360_v19, 0.0  ;;  %v295_v48 = vsel %vm178_vm1, %v2180_v14, 0.0  ;;  %v297_v52 = vsel %vm178_vm1, %v2191_v32, 0.0 }
  0x37   :  { %v284_v4 = vadd.f32 %v283_v45, %v282_v25  ;;  %v425_v60 = vadd.f32 %v424_v5, %v423_v13  ;;  %v2342_v53 = vsel %vm178_vm1, %v2195_v59, 0.0  ;;  %v363_v45 = vmul.f32 %v2324_v57, %v4238_v9 }
  0x38   :  { %v225_v46 = vadd.f32 %v224_v0, %v223_v22  ;;  %v428_v19 = vsel %vm178_vm1, %v361_v8, 0.0  ;;  %v2349_v32 = vsel %vm178_vm1, %v2200_v55, 0.0  ;;  %v2353_v26 = vsel %vm178_vm1, %v2204_v34, 0.0  ;;  %v2358_v0 = vld [vmem:[%s4059_s1 + $0x140] sm:$0xff] }
  0x39   :  { %v286_v14 = vadd.f32 %v285_v35, %v284_v4  ;;  %v427_v59 = vadd.f32 %v426_v16, %v425_v60  ;;  %v2362_v5 = vsel %vm178_vm1, %v2210_v50, 0.0  ;;  %v4239_v35 = vld [vmem:[#allocation7_spill] sm:$0xff]  ;;  %v430_v55 = vsel %vm178_vm1, %v362_v47, 0.0 }
  0x3a   :  { %v227_v13 = vadd.f32 %v226_v24, %v225_v46  ;;  %v364_v8 = vmul.f32 %v2338_v40, %v4239_v35  ;;  %v2369_v34 = vsel %vm178_vm1, %v2214_v18, 0.0  ;;  %v2373_v22 = vsel %vm178_vm1, %v2219_v15, 0.0  ;;  %v2378_v24 = vld [vmem:[%s4059_s1 + $0x148] sm:$0xff]  ;;  %v2383_v50 = vld [vmem:[%s4059_s1 + $0x150] sm:$0xff]  ;;  %v2389_v18 = vld [vmem:[%s4059_s1 + $0x158] sm:$0xff] }
  0x3b   :  { %v288_v25 = vadd.f32 %v287_v49, %v286_v14  ;;  %v429_v47 = vadd.f32 %v428_v19, %v427_v59  ;;  %v4240_v15 = vld [vmem:[#allocation8_spill] sm:$0xff]  ;;  %v4241_v4 = vld [vmem:[#allocation11_spill] sm:$0xff]  ;;  %v432_v46 = vsel %vm178_vm1, %v363_v45, 0.0  ;;  %v4243_v19 = vld [vmem:[#allocation13_spill] sm:$0xff]  ;;  %v366_v56 = vmul.f32 %v2378_v24, %v4244_v41 }
  0x3c   :  { %v229_v49 = vadd.f32 %v2253_v54, %v227_v13  ;;  %v365_v16 = vmul.f32 %v2358_v0, %v4240_v15  ;;  %v389_v60 = vmul.f32 %v2239_v28, %v4241_v4  ;;  %v4242_v14 = vld [vmem:[#allocation12_spill] sm:$0xff]  ;;  %v391_v54 = vmul.f32 %v2249_v37, %v4243_v19  ;;  %v4247_v45 = vld [vmem:[#allocation17_spill] sm:$0xff] }
  0x3d   :  { %v290_v9 = vadd.f32 %v289_v20, %v288_v25  ;;  %v390_v35 = vmul.f32 %v2244_v51, %v4242_v14  ;;  %v431_v59 = vadd.f32 %v430_v55, %v429_v47  ;;  %v367_v15 = vmul.f32 %v2383_v50, %v4245_v7  ;;  %v2409_v20 = vld [vmem:[%s4059_s1 + $0x160] sm:$0xff]  ;;  %v4246_v51 = vld [vmem:[#allocation14_spill] sm:$0xff] }
  0x3e   :  { %v231_v13 = vadd.f32 %v2257_v38, %v229_v49  ;;  %v434_v28 = vsel %vm178_vm1, %v364_v8, 0.0  ;;  %v368_v37 = vmul.f32 %v2389_v18, %v4246_v51  ;;  %v392_v38 = vmul.f32 %v2272_v63, %v4247_v45  ;;  %v4248_v25 = vld [vmem:[#allocation18_spill] sm:$0xff]  ;;  %v2446_v45 = vld [vmem:[%s4059_s1 + $0x178] sm:$0xff] }
  0x3f   :  { %v292_v4 = vadd.f32 %v291_v44, %v290_v9  ;;  %v433_v55 = vadd.f32 %v432_v46, %v431_v59  ;;  %v393_v7 = vmul.f32 %v2277_v17, %v4248_v25  ;;  %v436_v8 = vsel %vm178_vm1, %v365_v16, 0.0  ;;  %v2423_v49 = vld [vmem:[%s4059_s1 + $0x168] sm:$0xff]  ;;  %v4249_v46 = vld [vmem:[#allocation15_spill] sm:$0xff] }
  0x40   :  { %v233_v41 = vadd.f32 %v2262_v61, %v231_v13  ;;  %v490_v44 = vsel %vm178_vm1, %v389_v60, 0.0  ;;  %v491_v14 = vsel %vm178_vm1, %v390_v35, 0.0  ;;  %v493_v63 = vsel %vm178_vm1, %v391_v54, 0.0  ;;  %v4250_v59 = vld [vmem:[#allocation23_spill] sm:$0xff] }
  0x41   :  { %v294_v47 = vadd.f32 %v293_v36, %v292_v4  ;;  %v435_v9 = vadd.f32 %v434_v28, %v433_v55  ;;  %v369_v17 = vmul.f32 %v2409_v20, %v4249_v46  ;;  %v438_v16 = vsel %vm178_vm1, %v366_v56, 0.0  ;;  %v2434_v36 = vld [vmem:[%s4059_s1 + $0x170] sm:$0xff]  ;;  %v4251_v28 = vld [vmem:[#allocation16_spill] sm:$0xff] }
  0x42   :  { %v235_v61 = vadd.f32 %v2266_v27, %v233_v41  ;;  %v492_v19 = vadd.f32 %v491_v14, %v490_v44  ;;  %v394_v13 = vmul.f32 %v2310_v42, %v4250_v59  ;;  %v495_v54 = vsel %vm178_vm1, %v392_v38, 0.0  ;;  %v4252_v55 = vld [vmem:[#allocation27_spill] sm:$0xff] }
  0x43   :  { %v296_v60 = vadd.f32 %v295_v48, %v294_v47  ;;  %v437_v35 = vadd.f32 %v436_v8, %v435_v9  ;;  %v370_v4 = vmul.f32 %v2423_v49, %v4251_v28  ;;  %v440_v56 = vsel %vm178_vm1, %v367_v15, 0.0  ;;  %v4253_v25 = vld [vmem:[#allocation19_spill] sm:$0xff]  ;;  %v2459_v47 = vld [vmem:[%s4059_s1 + $0x180] sm:$0xff]  ;;  %v4258_v28 = vld [vmem:[#allocation38_spill] sm:$0xff] }
  0x44   :  { %v237_v27 = vadd.f32 %v2287_v33, %v235_v61  ;;  %v494_v51 = vadd.f32 %v493_v63, %v492_v19  ;;  %v395_v42 = vmul.f32 %v2324_v57, %v4252_v55  ;;  %v497_v38 = vsel %vm178_vm1, %v393_v7, 0.0  ;;  %v4254_v9 = vld [vmem:[#allocation31_spill] sm:$0xff]  ;;  %v4255_v63 = vld [vmem:[#allocation20_spill] sm:$0xff]  ;;  %v4259_v55 = vld [vmem:[#allocation22_spill] sm:$0xff] }
  0x45   :  { %v298_v48 = vadd.f32 %v297_v52, %v296_v60  ;;  %v439_v41 = vadd.f32 %v438_v16, %v437_v35  ;;  %v371_v8 = vmul.f32 %v2434_v36, %v4253_v25  ;;  %v442_v15 = vsel %vm178_vm1, %v368_v37, 0.0  ;;  %v2472_v16 = vld [vmem:[%s4059_s1 + $0x188] sm:$0xff]  ;;  %v4256_v19 = vld [vmem:[#allocation35_spill] sm:$0xff] }
  0x46   :  { %v239_v33 = vadd.f32 %v2291_v29, %v237_v27  ;;  %v496_v44 = vadd.f32 %v495_v54, %v494_v51  ;;  %v396_v57 = vmul.f32 %v2338_v40, %v4254_v9  ;;  %v499_v7 = vsel %vm178_vm1, %v394_v13, 0.0  ;;  %v4257_v13 = vld [vmem:[#allocation21_spill] sm:$0xff]  ;;  %v2484_v27 = vld [vmem:[%s4059_s1 + $0x190] sm:$0xff] }
  0x47   :  { %v300_v52 = vadd.f32 %v2342_v53, %v298_v48  ;;  %v441_v14 = vadd.f32 %v440_v56, %v439_v41  ;;  %v372_v61 = vmul.f32 %v2446_v45, %v4255_v63  ;;  %v444_v37 = vsel %vm178_vm1, %v369_v17, 0.0 }
  0x48   :  { %v241_v29 = vadd.f32 %v2295_v39, %v239_v33  ;;  %v498_v46 = vadd.f32 %v497_v38, %v496_v44  ;;  %v397_v40 = vmul.f32 %v2358_v0, %v4256_v19  ;;  %v501_v59 = vsel %vm178_vm1, %v395_v42, 0.0  ;;  %v2496_v38 = vld [vmem:[%s4059_s1 + $0x198] sm:$0xff]  ;;  %v4260_v33 = vld [vmem:[#allocation41_spill] sm:$0xff] }
  0x49   :  { %v302_v53 = vadd.f32 %v2349_v32, %v300_v52  ;;  %v443_v60 = vadd.f32 %v442_v15, %v441_v14  ;;  %v373_v35 = vmul.f32 %v2459_v47, %v4257_v13  ;;  %v446_v17 = vsel %vm178_vm1, %v370_v4, 0.0  ;;  %v4261_v52 = vld [vmem:[#allocation24_spill] sm:$0xff] }
  0x4a   :  { %v242_v39 = vrot.slane %v241_v29, 4  ;;  %v500_v54 = vadd.f32 %v499_v7, %v498_v46  ;;  %v398_v0 = vmul.f32 %v2378_v24, %v4258_v28  ;;  %v503_v51 = vsel %vm178_vm1, %v396_v57, 0.0  ;;  %v2508_v7 = vld [vmem:[%s4059_s1 + $0x1a0] sm:$0xff] }
  0x4b   :  { %v304_v32 = vadd.f32 %v2353_v26, %v302_v53  ;;  %v445_v56 = vadd.f32 %v444_v37, %v443_v60  ;;  %v374_v42 = vmul.f32 %v2472_v16, %v4259_v55  ;;  %v448_v4 = vsel %vm178_vm1, %v371_v8, 0.0  ;;  %v4263_v53 = vld [vmem:[#allocation25_spill] sm:$0xff] }
  0x4c   :  { %v243_v48 = vadd.f32 %v242_v39, %v241_v29  ;;  %v502_v41 = vadd.f32 %v501_v59, %v500_v54  ;;  %v399_v24 = vmul.f32 %v2383_v50, %v4260_v33  ;;  %v505_v15 = vsel %vm178_vm1, %v397_v40, 0.0  ;;  %v4262_v29 = vld [vmem:[#allocation43_spill] sm:$0xff]  ;;  %v2520_v59 = vld [vmem:[%s4059_s1 + $0x1a8] sm:$0xff]  ;;  %v4264_v39 = vld [vmem:[#allocation44_spill] sm:$0xff] }
  0x4d   :  { %v306_v26 = vadd.f32 %v2362_v5, %v304_v32  ;;  %v447_v25 = vadd.f32 %v446_v17, %v445_v56  ;;  %v375_v57 = vmul.f32 %v2484_v27, %v4261_v52  ;;  %v450_v8 = vsel %vm178_vm1, %v372_v61, 0.0  ;;  %v4265_v32 = vld [vmem:[#allocation26_spill] sm:$0xff] }
  0x4e   :  { %v244_v44 = vrot.slane %v243_v48, 2  ;;  %v504_v14 = vadd.f32 %v503_v51, %v502_v41  ;;  %v400_v50 = vmul.f32 %v2389_v18, %v4262_v29  ;;  %v507_v37 = vsel %vm178_vm1, %v398_v0, 0.0 }
  0x4f   :  { %v308_v5 = vadd.f32 %v2369_v34, %v306_v26  ;;  %v449_v63 = vadd.f32 %v448_v4, %v447_v25  ;;  %v376_v40 = vmul.f32 %v2496_v38, %v4263_v53  ;;  %v452_v61 = vsel %vm178_vm1, %v373_v35, 0.0  ;;  %v4266_v26 = vld [vmem:[#allocation28_spill] sm:$0xff]  ;;  %v1325_v53 = vld [vmem:[%s4059_s1 + $0x1c8] sm:$0xff] }
  0x50   :  { %v245_v46 = vadd.f32 %v244_v44, %v243_v48  ;;  %v506_v60 = vadd.f32 %v505_v15, %v504_v14  ;;  %v401_v18 = vmul.f32 %v2409_v20, %v4264_v39  ;;  %v509_v17 = vsel %vm178_vm1, %v399_v24, 0.0  ;;  %v2531_v48 = vld [vmem:[%s4059_s1 + $0x1b0] sm:$0xff]  ;;  %v2542_v44 = vld [vmem:[%s4059_s1 + $0x1b8] sm:$0xff] }
  0x51   :  { %v310_v34 = vadd.f32 %v2373_v22, %v308_v5  ;;  %v451_v13 = vadd.f32 %v450_v8, %v449_v63  ;;  %v377_v0 = vmul.f32 %v2508_v7, %v4265_v32  ;;  %v454_v35 = vsel %vm178_vm1, %v374_v42, 0.0  ;;  %v317_v22 = vld [vmem:[#allocation2] sm:$0x1] }
  0x52   :  { %v246_v54 = vrot.slane %v245_v46, 1  ;;  %v508_v56 = vadd.f32 %v507_v37, %v506_v60  ;;  %v402_v20 = vmul.f32 %v2423_v49, %v2025_v31  ;;  %v511_v4 = vsel %vm178_vm1, %v400_v50, 0.0  ;;  %v2547_v49 = vld [vmem:[%s4059_s1 + $0x1c0] sm:$0xff] }
  0x53   :  { %v311_v51 = vrot.slane %v310_v34, 4  ;;  %v453_v55 = vadd.f32 %v452_v61, %v451_v13  ;;  %v378_v24 = vmul.f32 %v2520_v59, %v4266_v26  ;;  %v456_v42 = vsel %vm178_vm1, %v375_v57, 0.0  ;;  %v4267_v57 = vld [vmem:[#allocation29_spill] sm:$0xff]  ;;  %v1326_v61 = vld [vmem:[%s4059_s1 + $0x1d0] sm:$0xff] }
  0x54   :  { %v247_v41 = vadd.f32 %v246_v54, %v245_v46  ;;  %v510_v25 = vadd.f32 %v509_v17, %v508_v56  ;;  %v403_v52 = vmul.f32 %v2434_v36, %v2030_v30  ;;  %v513_v14 = vsel %vm178_vm1, %v401_v18, 0.0  ;;  %v4269_v18 = vld [vmem:[#allocation32_spill] sm:$0xff] }
  0x55   :  { %v312_v15 = vadd.f32 %v311_v51, %v310_v34  ;;  %v455_v8 = vadd.f32 %v454_v35, %v453_v55  ;;  %v379_v50 = vmul.f32 %v2531_v48, %v4267_v57  ;;  %v458_v63 = vsel %vm178_vm1, %v376_v40, 0.0  ;;  %v4268_v34 = vld [vmem:[#allocation30_spill] sm:$0xff]  ;;  %v1327_v35 = vld [vmem:[%s4059_s1 + $0x1d8] sm:$0xff] }
  0x56   :  { %v319_v5 = vadd.f32 %v317_v22, %v247_v41  ;;  %v512_v37 = vadd.f32 %v511_v4, %v510_v25  ;;  %v404_v30 = vmul.f32 %v2446_v45, %v2043_v6  ;;  %v515_v60 = vsel %vm178_vm1, %v402_v20, 0.0  ;;  %v1328_v6 = vld [vmem:[%s4059_s1 + $0x1e0] sm:$0xff]  ;;  %v4272_v4 = vld [vmem:[#allocation34_spill] sm:$0xff] }
  0x57   :  { %v313_v46 = vrot.slane %v312_v15, 2  ;;  %v457_v36 = vadd.f32 %v456_v42, %v455_v8  ;;  %v380_v40 = vmul.f32 %v2542_v44, %v4268_v34  ;;  %v381_v13 = vmul.f32 %v2547_v49, %v4269_v18  ;;  %v4270_v45 = vld [vmem:[#allocation45_spill] sm:$0xff]  ;;  %v1329_v25 = vld [vmem:[%s4059_s1 + $0x1e8] sm:$0xff] }
  0x58   :  { %322 = vst.msk [vmem:[#allocation2] sm:$0x1] %vm321_vm2, %v319_v5  ;;  %v460_v17 = vsel %vm178_vm1, %v377_v0, 0.0  ;;  %v514_v54 = vadd.f32 %v513_v14, %v512_v37  ;;  %v405_v56 = vmul.f32 %v2459_v47, %v4270_v45  ;;  %v517_v22 = vsel %vm178_vm1, %v403_v52, 0.0  ;;  %v4271_v20 = vld [vmem:[#allocation33_spill] sm:$0xff]  ;;  %v4273_v5 = vld [vmem:[#allocation36_spill] sm:$0xff] }
  0x59   :  { %v314_v32 = vadd.f32 %v313_v46, %v312_v15  ;;  %v459_v51 = vadd.f32 %v458_v63, %v457_v36  ;;  %v382_v55 = vmul.f32 %v1325_v53, %v4271_v20  ;;  %v383_v0 = vmul.f32 %v1326_v61, %v4272_v4  ;;  %v1330_v15 = vld [vmem:[%s4059_s1 + $0x1f0] sm:$0xff]  ;;  %v318_v14 = vld [vmem:[#allocation2 + $0x8] sm:$0x1] }
  0x5a   :  { %v462_v41 = vsel %vm178_vm1, %v378_v24, 0.0  ;;  %v516_v26 = vadd.f32 %v515_v60, %v514_v54  ;;  %v406_v47 = vmul.f32 %v2472_v16, %v2062_v58  ;;  %v519_v8 = vsel %vm178_vm1, %v404_v30, 0.0  ;;  %v4274_v24 = vld [vmem:[#allocation37_spill] sm:$0xff]  ;;  %v1331_v60 = vld [vmem:[%s4059_s1 + $0x1f8] sm:$0xff]  ;;  %v4275_v34 = vld [vmem:[#allocation46_spill] sm:$0xff] }
  0x5b   :  { %v315_v42 = vrot.slane %v314_v32, 1  ;;  %v461_v52 = vadd.f32 %v460_v17, %v459_v51  ;;  %v384_v57 = vmul.f32 %v1327_v35, %v4273_v5  ;;  %v385_v63 = vmul.f32 %v1328_v6, %v4274_v24  ;;  %v4276_v30 = vld [vmem:[#allocation39_spill] sm:$0xff]  ;;  %v4277_v54 = vld [vmem:[#allocation40_spill] sm:$0xff] }
  0x5c   :  { %v464_v37 = vsel %vm178_vm1, %v379_v50, 0.0  ;;  %v518_v46 = vadd.f32 %v517_v22, %v516_v26  ;;  %v407_v18 = vmul.f32 %v2484_v27, %v4275_v34  ;;  %v521_v16 = vsel %vm178_vm1, %v405_v56, 0.0  ;;  %v4278_v26 = vld [vmem:[#allocation42_spill] sm:$0xff]  ;;  %v4279_v27 = vld [vmem:[#allocation47_spill] sm:$0xff] }
  0x5d   :  { %v316_v36 = vadd.f32 %v315_v42, %v314_v32  ;;  %v463_v58 = vadd.f32 %v462_v41, %v461_v52  ;;  %v386_v17 = vmul.f32 %v1329_v25, %v4276_v30  ;;  %v387_v45 = vmul.f32 %v1330_v15, %v4277_v54 }
  0x5e   :  { %v466_v51 = vsel %vm178_vm1, %v380_v40, 0.0  ;;  %v520_v20 = vadd.f32 %v519_v8, %v518_v46  ;;  %v408_v32 = vmul.f32 %v2496_v38, %v2078_v10  ;;  %v523_v4 = vsel %vm178_vm1, %v406_v47, 0.0  ;;  %v4280_v8 = vld [vmem:[#allocation48_spill] sm:$0xff]  ;;  %v4281_v47 = vld [vmem:[#allocation49_spill] sm:$0xff] }
  0x5f   :  { %v320_v50 = vadd.f32 %v318_v14, %v316_v36  ;;  %v465_v22 = vadd.f32 %v464_v37, %v463_v58  ;;  %v388_v42 = vmul.f32 %v1331_v60, %v4278_v26  ;;  %v409_v41 = vmul.f32 %v2508_v7, %v4279_v27  ;;  %v2624_v37 = vld [vmem:[%s4059_s1 + $0x200] sm:$0xff]  ;;  %v2647_v58 = vld [vmem:[%s4059_s1 + $0x218] sm:$0xff] }
  0x60   :  { %v468_v56 = vsel %vm178_vm1, %v381_v13, 0.0  ;;  %v522_v52 = vadd.f32 %v521_v16, %v520_v20  ;;  %v410_v40 = vmul.f32 %v2520_v59, %v2093_v43  ;;  %v411_v14 = vmul.f32 %v2531_v48, %v4280_v8  ;;  %v4282_v43 = vld [vmem:[#allocation50_spill] sm:$0xff] }
  0x61   :  { %323 = vst.msk [vmem:[#allocation2 + $0x8] sm:$0x1] %vm321_vm2, %v320_v50  ;;  %v467_v10 = vadd.f32 %v466_v51, %v465_v22  ;;  %v525_v38 = vsel %vm178_vm1, %v407_v18, 0.0  ;;  %v412_v5 = vmul.f32 %v2542_v44, %v4281_v47  ;;  %v413_v7 = vmul.f32 %v2547_v49, %v2114_v11  ;;  %v2632_v44 = vld [vmem:[%s4059_s1 + $0x208] sm:$0xff]  ;;  %v2637_v11 = vld [vmem:[%s4059_s1 + $0x210] sm:$0xff] }
  0x62   :  { %v470_v13 = vsel %vm178_vm1, %v382_v55, 0.0  ;;  %v524_v24 = vadd.f32 %v523_v4, %v522_v52  ;;  %v414_v59 = vmul.f32 %v1325_v53, %v4282_v43  ;;  %v415_v48 = vmul.f32 %v1326_v61, %v2133_v12  ;;  %v4285_v50 = vld [vmem:[#allocation3_spill] sm:$0xff]  ;;  %v2673_v22 = vld [vmem:[%s4059_s1 + $0x228] sm:$0xff] }
  0x63   :  { %v469_v46 = vadd.f32 %v468_v56, %v467_v10  ;;  %v527_v36 = vsel %vm178_vm1, %v408_v32, 0.0  ;;  %v416_v49 = vmul.f32 %v1327_v35, %v2148_v62  ;;  %v417_v55 = vmul.f32 %v1328_v6, %v2153_v23  ;;  %v4283_v6 = vld [vmem:[#allocation51_spill] sm:$0xff] }
  0x64   :  { %v472_v53 = vsel %vm178_vm1, %v383_v0, 0.0  ;;  %v526_v12 = vadd.f32 %v525_v38, %v524_v24  ;;  %v418_v61 = vmul.f32 %v1329_v25, %v2167_v21  ;;  %v529_v18 = vsel %vm178_vm1, %v409_v41, 0.0  ;;  %v4284_v25 = vld [vmem:[#allocation52_spill] sm:$0xff]  ;;  %v4287_v38 = vld [vmem:[#allocation5_spill] sm:$0xff] }
  0x65   :  { %v471_v34 = vadd.f32 %v470_v13, %v469_v46  ;;  %v598_v16 = vmul.f32 %v2624_v37, %v1522_v1  ;;  %v474_v62 = vsel %vm178_vm1, %v384_v57, 0.0  ;;  %v599_v23 = vmul.f32 %v2632_v44, %v1527_v2  ;;  %v2662_v1 = vld [vmem:[%s4059_s1 + $0x220] sm:$0xff] }
  0x66   :  { %v528_v35 = vadd.f32 %v527_v36, %v526_v12  ;;  %v600_v21 = vmul.f32 %v2637_v11, %v1532_v3  ;;  %v419_v0 = vmul.f32 %v1330_v15, %v4283_v6  ;;  %v420_v30 = vmul.f32 %v1331_v60, %v4284_v25 }
  0x67   :  { %v473_v54 = vadd.f32 %v472_v53, %v471_v34  ;;  %v531_v51 = vsel %vm178_vm1, %v410_v40, 0.0  ;;  %v476_v57 = vsel %vm178_vm1, %v385_v63, 0.0  ;;  %v478_v20 = vsel %vm178_vm1, %v386_v17, 0.0  ;;  %v4286_v63 = vld [vmem:[#allocation4_spill] sm:$0xff]  ;;  %v2685_v40 = vld [vmem:[%s4059_s1 + $0x230] sm:$0xff] }
  0x68   :  { %v530_v2 = vadd.f32 %v529_v18, %v528_v35  ;;  %v601_v3 = vmul.f32 %v2647_v58, %v4285_v50  ;;  %v480_v15 = vsel %vm178_vm1, %v387_v45, 0.0  ;;  %v533_v60 = vsel %vm178_vm1, %v411_v14, 0.0 }
  0x69   :  { %v475_v32 = vadd.f32 %v474_v62, %v473_v54  ;;  %v662_v4 = vsel %vm178_vm1, %v598_v16, 0.0  ;;  %v602_v17 = vmul.f32 %v2662_v1, %v4286_v63  ;;  %v663_v27 = vsel %vm178_vm1, %v599_v23, 0.0  ;;  %v2720_v23 = vld [vmem:[%s4059_s1 + $0x248] sm:$0xff]  ;;  %v2741_v54 = vld [vmem:[%s4058_s0 + $0x40] sm:$0xff] }
  0x6a   :  { %v532_v26 = vadd.f32 %v531_v51, %v530_v2  ;;  %v665_v41 = vsel %vm178_vm1, %v600_v21, 0.0  ;;  %v482_v45 = vsel %vm178_vm1, %v388_v42, 0.0  ;;  %v535_v52 = vsel %vm178_vm1, %v412_v5, 0.0  ;;  %v2696_v5 = vld [vmem:[%s4059_s1 + $0x238] sm:$0xff]  ;;  %v2753_v2 = vld [vmem:[%s4058_s0 + $0x100] sm:$0xff] }
  0x6b   :  { %v477_v56 = vadd.f32 %v476_v57, %v475_v32  ;;  %v664_v8 = vadd.f32 %v663_v27, %v662_v4  ;;  %v537_v10 = vsel %vm178_vm1, %v413_v7, 0.0  ;;  %v603_v47 = vmul.f32 %v2673_v22, %v4287_v38  ;;  %v2702_v7 = vld [vmem:[%s4059_s1 + $0x240] sm:$0xff]  ;;  %v2725_v21 = vld [vmem:[%s4058_s0 + $0x38] sm:$0xff]  ;;  %v2768_v4 = vld [vmem:[%s4058_s0 + $0x48] sm:$0xff] }
  0x6c   :  { %v534_v14 = vadd.f32 %v533_v60, %v532_v26  ;;  %v667_v13 = vsel %vm178_vm1, %v601_v3, 0.0  ;;  %v539_v43 = vsel %vm178_vm1, %v414_v59, 0.0  ;;  %v541_v42 = vsel %vm178_vm1, %v415_v48, 0.0  ;;  %v2707_v59 = vld [vmem:[%s4058_s0 + $0x30] sm:$0xff]  ;;  %v2760_v3 = vld [vmem:[%s4058_s0 + $0x108] sm:$0xff] }
  0x6d   :  { %v479_v24 = vadd.f32 %v478_v20, %v477_v56  ;;  %v666_v46 = vadd.f32 %v665_v41, %v664_v8  ;;  %v543_v53 = vsel %vm178_vm1, %v416_v49, 0.0  ;;  %v604_v48 = vmul.f32 %v2707_v59, %v2685_v40  ;;  %4288 = vst [vmem:[#allocation6_spill] sm:$0xff] %v2760_v3  ;;  %v2782_v27 = vld [vmem:[%s4058_s0 + $0x50] sm:$0xff]  ;;  %v2789_v56 = vld [vmem:[%s4058_s0 + $0x118] sm:$0xff] }
  0x6e   :  { %v536_v36 = vadd.f32 %v535_v52, %v534_v14  ;;  %v669_v12 = vsel %vm178_vm1, %v602_v17, 0.0  ;;  %v545_v18 = vsel %vm178_vm1, %v417_v55, 0.0  ;;  %v547_v49 = vsel %vm178_vm1, %v418_v61, 0.0  ;;  %v2797_v8 = vld [vmem:[%s4058_s0 + $0x58] sm:$0xff] }
  0x6f   :  { %v481_v34 = vadd.f32 %v480_v15, %v479_v24  ;;  %v668_v16 = vadd.f32 %v667_v13, %v666_v46  ;;  %v2715_v35 = vsel %vm178_vm1, %v419_v0, 0.0  ;;  %v605_v55 = vmul.f32 %v2725_v21, %v2696_v5  ;;  %v2736_v0 = vld [vmem:[%s4059_s1 + $0x250] sm:$0xff]  ;;  %v2811_v13 = vld [vmem:[%s4059_s1 + $0x260] sm:$0xff] }
  0x70   :  { %v538_v62 = vadd.f32 %v537_v10, %v536_v36  ;;  %v671_v61 = vsel %vm178_vm1, %v603_v47, 0.0  ;;  %v2731_v25 = vsel %vm178_vm1, %v420_v30, 0.0  ;;  %v606_v51 = vmul.f32 %v2741_v54, %v2702_v7  ;;  %v2748_v30 = vld [vmem:[%s4059_s1 + $0x258] sm:$0xff]  ;;  %v2804_v10 = vld [vmem:[%s4058_s0 + $0x120] sm:$0xff] }
  0x71   :  { %v483_v6 = vadd.f32 %v482_v45, %v481_v34  ;;  %v670_v57 = vadd.f32 %v669_v12, %v668_v16  ;;  %v630_v50 = vmul.f32 %v2753_v2, %v2624_v37  ;;  %v631_v32 = vmul.f32 %v2760_v3, %v2632_v44  ;;  %v2775_v37 = vld [vmem:[%s4058_s0 + $0x110] sm:$0xff] }
  0x72   :  { %v540_v20 = vadd.f32 %v539_v43, %v538_v62  ;;  %v673_v15 = vsel %vm178_vm1, %v604_v48, 0.0  ;;  %v607_v26 = vmul.f32 %v2768_v4, %v2720_v23  ;;  %v632_v63 = vmul.f32 %v2775_v37, %v2637_v11 }
  0x73   :  { %v484_v60 = vrot.slane %v483_v6, 4  ;;  %v672_v44 = vadd.f32 %v671_v61, %v670_v57  ;;  %v608_v41 = vmul.f32 %v2782_v27, %v2736_v0  ;;  %v633_v45 = vmul.f32 %v2789_v56, %v2647_v58 }
  0x74   :  { %v542_v17 = vadd.f32 %v541_v42, %v540_v20  ;;  %v675_v11 = vsel %vm178_vm1, %v605_v55, 0.0  ;;  %v609_v14 = vmul.f32 %v2797_v8, %v2748_v30  ;;  %v634_v38 = vmul.f32 %v2804_v10, %v2662_v1  ;;  %v2820_v1 = vld [vmem:[%s4059_s1 + $0x268] sm:$0xff] }
  0x75   :  { %v485_v52 = vadd.f32 %v484_v60, %v483_v6  ;;  %v674_v58 = vadd.f32 %v673_v15, %v672_v44  ;;  %v677_v24 = vsel %vm178_vm1, %v606_v51, 0.0  ;;  %v731_v43 = vsel %vm178_vm1, %v630_v50, 0.0  ;;  %v2846_v50 = vld [vmem:[%s4058_s0 + $0x130] sm:$0xff] }
  0x76   :  { %v544_v47 = vadd.f32 %v543_v53, %v542_v17  ;;  %v732_v42 = vsel %vm178_vm1, %v631_v32, 0.0  ;;  %v734_v12 = vsel %vm178_vm1, %v632_v63, 0.0  ;;  %v2825_v53 = vld [vmem:[%s4058_s0 + $0x128] sm:$0xff]  ;;  %v679_v62 = vsel %vm178_vm1, %v607_v26, 0.0 }
  0x77   :  { %v486_v46 = vrot.slane %v485_v52, 2  ;;  %v676_v36 = vadd.f32 %v675_v11, %v674_v58  ;;  %v733_v48 = vadd.f32 %v732_v42, %v731_v43  ;;  %v635_v16 = vmul.f32 %v2825_v53, %v2673_v22  ;;  %v2841_v22 = vld [vmem:[%s4059_s1 + $0x270] sm:$0xff]  ;;  %v559_v11 = vld [vmem:[#allocation2 + $0x1] sm:$0x1] }
  0x78   :  { %v546_v34 = vadd.f32 %v545_v18, %v544_v47  ;;  %v736_v55 = vsel %vm178_vm1, %v633_v45, 0.0  ;;  %v2834_v18 = vld [vmem:[%s4058_s0 + $0x60] sm:$0xff]  ;;  %v636_v32 = vmul.f32 %v2846_v50, %v2685_v40  ;;  %v681_v15 = vsel %vm178_vm1, %v608_v41, 0.0  ;;  %v2863_v40 = vld [vmem:[%s4059_s1 + $0x278] sm:$0xff]  ;;  %v2872_v47 = vld [vmem:[%s4058_s0 + $0x70] sm:$0xff] }
  0x79   :  { %v487_v61 = vadd.f32 %v486_v46, %v485_v52  ;;  %v610_v6 = vmul.f32 %v2834_v18, %v2811_v13  ;;  %v678_v51 = vadd.f32 %v677_v24, %v676_v36  ;;  %v735_v57 = vadd.f32 %v734_v12, %v733_v48 }
  0x7a   :  { %v548_v20 = vadd.f32 %v547_v49, %v546_v34  ;;  %v738_v60 = vsel %vm178_vm1, %v634_v38, 0.0  ;;  %v2855_v49 = vld [vmem:[%s4058_s0 + $0x68] sm:$0xff]  ;;  %v637_v41 = vmul.f32 %v2696_v5, %v4254_v9  ;;  %v683_v52 = vsel %vm178_vm1, %v609_v14, 0.0  ;;  %v2880_v9 = vld [vmem:[%s4059_s1 + $0x280] sm:$0xff] }
  0x7b   :  { %v488_v26 = vrot.slane %v487_v61, 1  ;;  %v611_v63 = vmul.f32 %v2855_v49, %v2820_v1  ;;  %v680_v44 = vadd.f32 %v679_v62, %v678_v51  ;;  %v737_v17 = vadd.f32 %v736_v55, %v735_v57  ;;  %v2885_v5 = vld [vmem:[%s4059_s1 + $0x288] sm:$0xff]  ;;  %v2916_v51 = vld [vmem:[%s4058_s0 + $0x80] sm:$0xff] }
  0x7c   :  { %v550_v45 = vadd.f32 %v2715_v35, %v548_v20  ;;  %v740_v38 = vsel %vm178_vm1, %v635_v16, 0.0  ;;  %v612_v35 = vmul.f32 %v2872_v47, %v2841_v22  ;;  %v638_v14 = vmul.f32 %v2702_v7, %v4256_v19  ;;  %v2901_v19 = vld [vmem:[%s4059_s1 + $0x290] sm:$0xff]  ;;  %v2906_v7 = vld [vmem:[%s4059_s1 + $0x298] sm:$0xff]  ;;  %4290 = vst [vmem:[#allocation8_spill] sm:$0xff] %v2916_v51  ;;  %v2923_v20 = vld [vmem:[%s4058_s0 + $0x88] sm:$0xff] }
  0x7d   :  { %v489_v58 = vadd.f32 %v488_v26, %v487_v61  ;;  %v682_v24 = vadd.f32 %v681_v15, %v680_v44  ;;  %v739_v43 = vadd.f32 %v738_v60, %v737_v17  ;;  %v685_v46 = vsel %vm178_vm1, %v610_v6, 0.0  ;;  %4291 = vst [vmem:[#allocation11_spill] sm:$0xff] %v2923_v20  ;;  %v2930_v60 = vld [vmem:[%s4059_s1 + $0x2a0] sm:$0xff]  ;;  %v2935_v26 = vld [vmem:[%s4059_s1 + $0x2a8] sm:$0xff] }
  0x7e   :  { %v552_v42 = vadd.f32 %v2731_v25, %v550_v45  ;;  %v742_v36 = vsel %vm178_vm1, %v636_v32, 0.0  ;;  %v2894_v25 = vld [vmem:[%s4058_s0 + $0x78] sm:$0xff]  ;;  %v639_v55 = vmul.f32 %v2720_v23, %v4258_v28  ;;  %v687_v61 = vsel %vm178_vm1, %v611_v63, 0.0  ;;  %v2944_v45 = vld [vmem:[%s4058_s0 + $0x90] sm:$0xff] }
  0x7f   :  { %v561_v48 = vadd.f32 %v559_v11, %v489_v58  ;;  %4289 = vst [vmem:[#allocation7_spill] sm:$0xff] %v2894_v25  ;;  %v613_v12 = vmul.f32 %v2894_v25, %v2863_v40  ;;  %v684_v34 = vadd.f32 %v683_v52, %v682_v24  ;;  %v741_v16 = vadd.f32 %v740_v38, %v739_v43  ;;  %v2958_v58 = vld [vmem:[%s4059_s1 + $0x2b0] sm:$0xff] }
  0x80   :  { %v553_v62 = vrot.slane %v552_v42, 4  ;;  %v744_v6 = vsel %vm178_vm1, %v637_v41, 0.0  ;;  %v614_v57 = vmul.f32 %v2916_v51, %v2880_v9  ;;  %v615_v28 = vmul.f32 %v2923_v20, %v2885_v5  ;;  %4292 = vst [vmem:[#allocation12_spill] sm:$0xff] %v2944_v45  ;;  %v2951_v41 = vld [vmem:[%s4058_s0 + $0x98] sm:$0xff] }
  0x81   :  { %563 = vst.msk [vmem:[#allocation2 + $0x1] sm:$0x1] %vm321_vm2, %v561_v48  ;;  %v686_v23 = vadd.f32 %v685_v46, %v684_v34  ;;  %v743_v32 = vadd.f32 %v742_v36, %v741_v16  ;;  %v640_v63 = vmul.f32 %v2736_v0, %v4260_v33  ;;  %v689_v44 = vsel %vm178_vm1, %v612_v35, 0.0  ;;  %4293 = vst [vmem:[#allocation13_spill] sm:$0xff] %v2951_v41  ;;  %v2963_v35 = vld [vmem:[%s4059_s1 + $0x2b8] sm:$0xff]  ;;  %v2979_v36 = vld [vmem:[%s4058_s0 + $0xa8] sm:$0xff] }
  0x82   :  { %v554_v15 = vadd.f32 %v553_v62, %v552_v42  ;;  %v746_v17 = vsel %vm178_vm1, %v638_v14, 0.0  ;;  %v616_v11 = vmul.f32 %v2944_v45, %v2901_v19  ;;  %v617_v33 = vmul.f32 %v2951_v41, %v2906_v7  ;;  %v2972_v14 = vld [vmem:[%s4058_s0 + $0xa0] sm:$0xff]  ;;  %4295 = vst [vmem:[#allocation10_spill] sm:$0xff] %v2979_v36  ;;  %v2993_v16 = vld [vmem:[%s4059_s1 + $0x2c8] sm:$0xff] }
  0x83   :  { %v688_v0 = vadd.f32 %v687_v61, %v686_v23  ;;  %v745_v52 = vadd.f32 %v744_v6, %v743_v32  ;;  %v641_v24 = vmul.f32 %v2748_v30, %v4262_v29  ;;  %v691_v43 = vsel %vm178_vm1, %v613_v12, 0.0  ;;  %4294 = vst [vmem:[#allocation9_spill] sm:$0xff] %v2972_v14  ;;  %v2988_v34 = vld [vmem:[%s4059_s1 + $0x2c0] sm:$0xff]  ;;  %v3002_v6 = vld [vmem:[%s4058_s0 + $0xb0] sm:$0xff]  ;;  %v3011_v32 = vld [vmem:[%s4058_s0 + $0xb8] sm:$0xff] }
  0x84   :  { %v555_v38 = vrot.slane %v554_v15, 2  ;;  %v748_v42 = vsel %vm178_vm1, %v639_v55, 0.0  ;;  %v618_v46 = vmul.f32 %v2972_v14, %v2930_v60  ;;  %v2983_v29 = vmul.f32 %v2979_v36, %v2935_v26  ;;  %4296 = vst [vmem:[#allocation14_spill] sm:$0xff] %v3002_v6  ;;  %4297 = vst [vmem:[#allocation17_spill] sm:$0xff] %v3011_v32 }
  0x85   :  { %v690_v30 = vadd.f32 %v689_v44, %v688_v0  ;;  %v747_v48 = vadd.f32 %v746_v17, %v745_v52  ;;  %v642_v62 = vmul.f32 %v2811_v13, %v4264_v39  ;;  %v693_v55 = vsel %vm178_vm1, %v614_v57, 0.0  ;;  %v3025_v44 = vld [vmem:[%s4059_s1 + $0x2d8] sm:$0xff] }
  0x86   :  { %v556_v12 = vadd.f32 %v555_v38, %v554_v15  ;;  %v750_v61 = vsel %vm178_vm1, %v640_v63, 0.0  ;;  %v3006_v23 = vmul.f32 %v3002_v6, %v2958_v58  ;;  %v3015_v39 = vmul.f32 %v3011_v32, %v2963_v35  ;;  %v3020_v63 = vld [vmem:[%s4059_s1 + $0x2d0] sm:$0xff]  ;;  %v560_v38 = vld [vmem:[#allocation2 + $0x9] sm:$0x1]  ;;  %v3094_v6 = vld [vmem:[%s4059_s1 + $0x2f8] sm:$0xff] }
  0x87   :  { %v692_v13 = vadd.f32 %v691_v43, %v690_v30  ;;  %v749_v57 = vadd.f32 %v748_v42, %v747_v48  ;;  %v643_v17 = vmul.f32 %v2820_v1, %v2025_v31  ;;  %v695_v0 = vsel %vm178_vm1, %v615_v28, 0.0  ;;  %v3034_v43 = vld [vmem:[%s4058_s0 + $0xc0] sm:$0xff]  ;;  %v3043_v30 = vld [vmem:[%s4058_s0 + $0xc8] sm:$0xff]  ;;  %v3062_v32 = vld [vmem:[%s4058_s0 + $0x170] sm:$0xff] }
  0x88   :  { %v557_v15 = vrot.slane %v556_v12, 1  ;;  %v752_v52 = vsel %vm178_vm1, %v641_v24, 0.0  ;;  %4298 = vst [vmem:[#allocation18_spill] sm:$0xff] %v3034_v43  ;;  %v3038_v42 = vmul.f32 %v3034_v43, %v2988_v34  ;;  %4299 = vst [vmem:[#allocation15_spill] sm:$0xff] %v3043_v30  ;;  %v3047_v31 = vmul.f32 %v3043_v30, %v2993_v16  ;;  %v3052_v48 = vld [vmem:[%s4059_s1 + $0x2e0] sm:$0xff]  ;;  %v3057_v43 = vld [vmem:[%s4059_s1 + $0x2e8] sm:$0xff] }
  0x89   :  { %v694_v1 = vadd.f32 %v693_v55, %v692_v13  ;;  %v751_v28 = vadd.f32 %v750_v61, %v749_v57  ;;  %4300 = vst [vmem:[#allocation23_spill] sm:$0xff] %v3062_v32  ;;  %v644_v55 = vmul.f32 %v3062_v32, %v2841_v22  ;;  %v754_v61 = vsel %vm178_vm1, %v642_v62, 0.0  ;;  %v3071_v13 = vld [vmem:[%s4059_s1 + $0x2f0] sm:$0xff]  ;;  %v3085_v22 = vld [vmem:[%s4058_s0 + $0xd8] sm:$0xff] }
  0x8a   :  { %v558_v24 = vadd.f32 %v557_v15, %v556_v12  ;;  %v697_v12 = vsel %vm178_vm1, %v616_v11, 0.0  ;;  %v3076_v57 = vld [vmem:[%s4058_s0 + $0xd0] sm:$0xff]  ;;  %4302 = vst [vmem:[#allocation27_spill] sm:$0xff] %v3085_v22  ;;  %v3089_v11 = vmul.f32 %v3085_v22, %v3025_v44  ;;  %v699_v14 = vsel %vm178_vm1, %v617_v33, 0.0 }
  0x8b   :  { %4301 = vst [vmem:[#allocation16_spill] sm:$0xff] %v3076_v57  ;;  %v3080_v15 = vmul.f32 %v3076_v57, %v3020_v63  ;;  %v696_v62 = vadd.f32 %v695_v0, %v694_v1  ;;  %v753_v30 = vadd.f32 %v752_v52, %v751_v28  ;;  %v3099_v57 = vld [vmem:[%s4058_s0 + $0x178] sm:$0xff]  ;;  %v756_v22 = vsel %vm178_vm1, %v643_v17, 0.0  ;;  %v3108_v0 = vld [vmem:[%s4058_s0 + $0xe0] sm:$0xff]  ;;  %v3127_v1 = vld [vmem:[%s4058_s0 + $0xf0] sm:$0xff] }
  0x8c   :  { %v562_v32 = vadd.f32 %v560_v38, %v558_v24  ;;  %4303 = vst [vmem:[#allocation19_spill] sm:$0xff] %v3099_v57  ;;  %v645_v36 = vmul.f32 %v3099_v57, %v2863_v40  ;;  %4304 = vst [vmem:[#allocation31_spill] sm:$0xff] %v3108_v0  ;;  %v3112_v52 = vmul.f32 %v3108_v0, %v3052_v48  ;;  %v3117_v38 = vld [vmem:[%s4058_s0 + $0xe8] sm:$0xff]  ;;  %v3136_v24 = vld [vmem:[%s4058_s0 + $0x180] sm:$0xff] }
  0x8d   :  { %4305 = vst [vmem:[#allocation20_spill] sm:$0xff] %v3117_v38  ;;  %v3121_v40 = vmul.f32 %v3117_v38, %v3057_v43  ;;  %v698_v33 = vadd.f32 %v697_v12, %v696_v62  ;;  %v755_v17 = vadd.f32 %v754_v61, %v753_v30  ;;  %4306 = vst [vmem:[#allocation35_spill] sm:$0xff] %v3127_v1  ;;  %v701_v30 = vsel %vm178_vm1, %v618_v46, 0.0  ;;  %v3145_v61 = vld [vmem:[%s4058_s0 + $0xf8] sm:$0xff] }
  0x8e   :  { %564 = vst.msk [vmem:[#allocation2 + $0x9] sm:$0x1] %vm321_vm2, %v562_v32  ;;  %v3131_v28 = vmul.f32 %v3127_v1, %v3071_v13  ;;  %4307 = vst [vmem:[#allocation21_spill] sm:$0xff] %v3136_v24  ;;  %v646_v12 = vmul.f32 %v3136_v24, %v2880_v9  ;;  %v758_v32 = vsel %vm178_vm1, %v644_v55, 0.0  ;;  %v3149_v62 = vmul.f32 %v3145_v61, %v3094_v6  ;;  %v3154_v1 = vld [vmem:[%s4058_s0 + $0x188] sm:$0xff]  ;;  %v3161_v55 = vld [vmem:[%s4058_s0 + $0x190] sm:$0xff] }
  0x8f   :  { %4308 = vst [vmem:[#allocation38_spill] sm:$0xff] %v3145_v61  ;;  %v647_v9 = vmul.f32 %v3154_v1, %v2885_v5  ;;  %v700_v46 = vadd.f32 %v699_v14, %v698_v33  ;;  %v757_v38 = vadd.f32 %v756_v22, %v755_v17  ;;  %v648_v0 = vmul.f32 %v3161_v55, %v2901_v19  ;;  %v3168_v61 = vld [vmem:[%s4058_s0 + $0x198] sm:$0xff]  ;;  %v3178_v22 = vld [vmem:[%s4058_s0 + $0x1a0] sm:$0xff]  ;;  %v3185_v33 = vld [vmem:[%s4058_s0 + $0x1a8] sm:$0xff] }
  0x90   :  { %4309 = vst [vmem:[#allocation22_spill] sm:$0xff] %v3168_v61  ;;  %v649_v24 = vmul.f32 %v3168_v61, %v2906_v7  ;;  %v703_v5 = vsel %vm178_vm1, %v2983_v29, 0.0  ;;  %v760_v14 = vsel %vm178_vm1, %v645_v36, 0.0  ;;  %4310 = vst [vmem:[#allocation41_spill] sm:$0xff] %v3178_v22  ;;  %v650_v19 = vmul.f32 %v3178_v22, %v2930_v60  ;;  %v3192_v36 = vld [vmem:[%s4058_s0 + $0x1b0] sm:$0xff]  ;;  %v3201_v60 = vld [vmem:[%s4058_s0 + $0x1b8] sm:$0xff] }
  0x91   :  { %4311 = vst [vmem:[#allocation24_spill] sm:$0xff] %v3185_v33  ;;  %v651_v7 = vmul.f32 %v3185_v33, %v2935_v26  ;;  %v702_v17 = vadd.f32 %v701_v30, %v700_v46  ;;  %v759_v29 = vadd.f32 %v758_v32, %v757_v38  ;;  %4312 = vst [vmem:[#allocation43_spill] sm:$0xff] %v3192_v36  ;;  %v705_v26 = vsel %vm178_vm1, %v3006_v23, 0.0  ;;  %v3213_v30 = vld [vmem:[%s4058_s0 + $0x1c0] sm:$0xff]  ;;  %v3222_v32 = vld [vmem:[%s4058_s0 + $0x1c8] sm:$0xff] }
  0x92   :  { %v3196_v61 = vmul.f32 %v3192_v36, %v2958_v58  ;;  %4313 = vst [vmem:[#allocation25_spill] sm:$0xff] %v3201_v60  ;;  %v3205_v22 = vmul.f32 %v3201_v60, %v2963_v35  ;;  %v762_v38 = vsel %vm178_vm1, %v646_v12, 0.0  ;;  %4314 = vst [vmem:[#allocation44_spill] sm:$0xff] %v3213_v30  ;;  %v3217_v58 = vmul.f32 %v3213_v30, %v2988_v34  ;;  %v3231_v46 = vld [vmem:[%s4058_s0 + $0x1d0] sm:$0xff]  ;;  %v3240_v30 = vld [vmem:[%s4058_s0 + $0x1d8] sm:$0xff] }
  0x93   :  { %4315 = vst [vmem:[#allocation26_spill] sm:$0xff] %v3222_v32  ;;  %v3226_v35 = vmul.f32 %v3222_v32, %v2993_v16  ;;  %v704_v23 = vadd.f32 %v703_v5, %v702_v17  ;;  %v761_v12 = vadd.f32 %v760_v14, %v759_v29  ;;  %4316 = vst [vmem:[#allocation28_spill] sm:$0xff] %v3231_v46  ;;  %v707_v5 = vsel %vm178_vm1, %v3015_v39, 0.0  ;;  %v3252_v17 = vld [vmem:[%s4058_s0 + $0x1e0] sm:$0xff]  ;;  %v3261_v29 = vld [vmem:[%s4058_s0 + $0x1e8] sm:$0xff] }
  0x94   :  { %v3235_v34 = vmul.f32 %v3231_v46, %v3020_v63  ;;  %4317 = vst [vmem:[#allocation29_spill] sm:$0xff] %v3240_v30  ;;  %v3244_v16 = vmul.f32 %v3240_v30, %v3025_v44  ;;  %v764_v14 = vsel %vm178_vm1, %v647_v9, 0.0  ;;  %4318 = vst [vmem:[#allocation30_spill] sm:$0xff] %v3252_v17  ;;  %v3256_v63 = vmul.f32 %v3252_v17, %v3052_v48  ;;  %v3270_v30 = vld [vmem:[%s4059_s1 + $0x300] sm:$0xff]  ;;  %v3275_v48 = vld [vmem:[%s4059_s1 + $0x308] sm:$0xff] }
  0x95   :  { %4319 = vst [vmem:[#allocation32_spill] sm:$0xff] %v3261_v29  ;;  %v3265_v44 = vmul.f32 %v3261_v29, %v3057_v43  ;;  %v706_v39 = vadd.f32 %v705_v26, %v704_v23  ;;  %v763_v9 = vadd.f32 %v762_v38, %v761_v12  ;;  %v3280_v17 = vld [vmem:[%s4059_s1 + $0x310] sm:$0xff]  ;;  %v3292_v38 = vld [vmem:[%s4058_s0 + $0x1f8] sm:$0xff]  ;;  %v709_v12 = vsel %vm178_vm1, %v3038_v42, 0.0  ;;  %v3314_v42 = vld [vmem:[%s4058_s0] sm:$0xff] }
  0x96   :  { %v3285_v43 = vld [vmem:[%s4058_s0 + $0x1f0] sm:$0xff]  ;;  %4321 = vst [vmem:[#allocation33_spill] sm:$0xff] %v3292_v38  ;;  %v3296_v23 = vmul.f32 %v3292_v38, %v3094_v6  ;;  %v766_v29 = vsel %vm178_vm1, %v648_v0, 0.0  ;;  %v711_v32 = vsel %vm178_vm1, %v3047_v31, 0.0  ;;  %v3308_v60 = vld [vmem:[%s4059_s1 + $0x318] sm:$0xff]  ;;  %v768_v6 = vsel %vm178_vm1, %v649_v24, 0.0 }
  0x97   :  { %4320 = vst [vmem:[#allocation45_spill] sm:$0xff] %v3285_v43  ;;  %v660_v26 = vmul.f32 %v3285_v43, %v3071_v13  ;;  %v708_v46 = vadd.f32 %v707_v5, %v706_v39  ;;  %v713_v13 = vsel %vm178_vm1, %v3080_v15, 0.0  ;;  %v765_v43 = vadd.f32 %v764_v14, %v763_v9  ;;  %4322 = vst [vmem:[#allocation34_spill] sm:$0xff] %v3314_v42  ;;  %v3321_v31 = vld [vmem:[%s4058_s0 + $0x8] sm:$0xff]  ;;  %v3328_v24 = vld [vmem:[%s4058_s0 + $0x10] sm:$0xff] }
  0x98   :  { %v839_v0 = vmul.f32 %v3314_v42, %v3270_v30  ;;  %4323 = vst [vmem:[#allocation36_spill] sm:$0xff] %v3321_v31  ;;  %v840_v15 = vmul.f32 %v3321_v31, %v3275_v48  ;;  %4324 = vst [vmem:[#allocation37_spill] sm:$0xff] %v3328_v24  ;;  %v841_v5 = vmul.f32 %v3328_v24, %v3280_v17  ;;  %v715_v39 = vsel %vm178_vm1, %v3089_v11, 0.0  ;;  %v3339_v31 = vld [vmem:[%s4059_s1 + $0x320] sm:$0xff]  ;;  %v3349_v11 = vld [vmem:[%s4058_s0 + $0x18] sm:$0xff] }
  0x99   :  { %v710_v14 = vadd.f32 %v709_v12, %v708_v46  ;;  %v717_v9 = vsel %vm178_vm1, %v3112_v52, 0.0  ;;  %v767_v42 = vadd.f32 %v766_v29, %v765_v43  ;;  %v719_v38 = vsel %vm178_vm1, %v3121_v40, 0.0  ;;  %4325 = vst [vmem:[#allocation46_spill] sm:$0xff] %v3349_v11  ;;  %v3376_v24 = vld [vmem:[%s4059_s1 + $0x330] sm:$0xff] }
  0x9a   :  { %v721_v36 = vsel %vm178_vm1, %v3131_v28, 0.0  ;;  %v770_v46 = vsel %vm178_vm1, %v650_v19, 0.0  ;;  %v842_v52 = vmul.f32 %v3349_v11, %v3308_v60  ;;  %v723_v43 = vsel %vm178_vm1, %v3149_v62, 0.0  ;;  %v3359_v28 = vld [vmem:[%s4059_s1 + $0x328] sm:$0xff]  ;;  %v3364_v19 = vld [vmem:[%s4058_s0 + $0x20] sm:$0xff] }
  0x9b   :  { %v712_v29 = vadd.f32 %v711_v32, %v710_v14  ;;  %v769_v12 = vadd.f32 %v768_v6, %v767_v42  ;;  %v772_v40 = vsel %vm178_vm1, %v651_v7, 0.0  ;;  %4326 = vst [vmem:[#allocation39_spill] sm:$0xff] %v3364_v19  ;;  %v843_v11 = vmul.f32 %v3364_v19, %v3339_v31 }
  0x9c   :  { %v903_v32 = vsel %vm178_vm1, %v839_v0, 0.0  ;;  %v904_v62 = vsel %vm178_vm1, %v840_v15, 0.0  ;;  %v906_v6 = vsel %vm178_vm1, %v841_v5, 0.0  ;;  %v774_v14 = vsel %vm178_vm1, %v3196_v61, 0.0 }
  0x9d   :  { %v714_v7 = vadd.f32 %v713_v13, %v712_v29  ;;  %v771_v42 = vadd.f32 %v770_v46, %v769_v12  ;;  %v905_v33 = vadd.f32 %v904_v62, %v903_v32  ;;  %v776_v19 = vsel %vm178_vm1, %v3205_v22, 0.0  ;;  %v3385_v13 = vld [vmem:[%s4058_s0 + $0x28] sm:$0xff]  ;;  %v3395_v22 = vld [vmem:[%s4059_s1 + $0x338] sm:$0xff] }
  0x9e   :  { %v778_v0 = vsel %vm178_vm1, %v3217_v58, 0.0  ;;  %v844_v61 = vmul.f32 %v3385_v13, %v3359_v28  ;;  %v908_v15 = vsel %vm178_vm1, %v842_v52, 0.0  ;;  %v780_v29 = vsel %vm178_vm1, %v3226_v35, 0.0 }
  0x9f   :  { %v716_v5 = vadd.f32 %v715_v39, %v714_v7  ;;  %v773_v46 = vadd.f32 %v772_v40, %v771_v42  ;;  %v907_v58 = vadd.f32 %v906_v6, %v905_v33  ;;  %v782_v12 = vsel %vm178_vm1, %v3235_v34, 0.0  ;;  %v3409_v33 = vld [vmem:[%s4059_s1 + $0x340] sm:$0xff] }
  0xa0   :  { %v784_v32 = vsel %vm178_vm1, %v3244_v16, 0.0  ;;  %v845_v52 = vmul.f32 %v2707_v59, %v3376_v24  ;;  %v910_v39 = vsel %vm178_vm1, %v843_v11, 0.0  ;;  %v786_v35 = vsel %vm178_vm1, %v3256_v63, 0.0 }
  0xa1   :  { %v718_v40 = vadd.f32 %v717_v9, %v716_v5  ;;  %v775_v62 = vadd.f32 %v774_v14, %v773_v46  ;;  %v909_v6 = vadd.f32 %v908_v15, %v907_v58  ;;  %v788_v34 = vsel %vm178_vm1, %v3265_v44, 0.0  ;;  %v3419_v9 = vld [vmem:[%s4059_s1 + $0x348] sm:$0xff]  ;;  %v3431_v44 = vld [vmem:[%s4059_s1 + $0x350] sm:$0xff]  ;;  %v3436_v15 = vld [vmem:[%s4059_s1 + $0x358] sm:$0xff] }
  0xa2   :  { %v3414_v16 = vsel %vm178_vm1, %v660_v26, 0.0  ;;  %v846_v63 = vmul.f32 %v2725_v21, %v3395_v22  ;;  %v912_v11 = vsel %vm178_vm1, %v844_v61, 0.0  ;;  %v3426_v14 = vsel %vm178_vm1, %v3296_v23, 0.0 }
  0xa3   :  { %v720_v7 = vadd.f32 %v719_v38, %v718_v40  ;;  %v777_v42 = vadd.f32 %v776_v19, %v775_v62  ;;  %v911_v26 = vadd.f32 %v910_v39, %v909_v6  ;;  %v847_v61 = vmul.f32 %v2741_v54, %v3409_v33 }
  0xa4   :  { %v871_v38 = vmul.f32 %v2753_v2, %v3270_v30  ;;  %v872_v23 = vmul.f32 %v2760_v3, %v3275_v48  ;;  %v914_v19 = vsel %vm178_vm1, %v845_v52, 0.0  ;;  %v848_v58 = vmul.f32 %v2768_v4, %v3419_v9 }
  0xa5   :  { %v722_v5 = vadd.f32 %v721_v36, %v720_v7  ;;  %v779_v46 = vadd.f32 %v778_v0, %v777_v42  ;;  %v913_v39 = vadd.f32 %v912_v11, %v911_v26  ;;  %v849_v40 = vmul.f32 %v2782_v27, %v3431_v44 }
  0xa6   :  { %v873_v62 = vmul.f32 %v2775_v37, %v3280_v17  ;;  %v874_v30 = vmul.f32 %v2789_v56, %v3308_v60  ;;  %v916_v6 = vsel %vm178_vm1, %v846_v63, 0.0  ;;  %v850_v36 = vmul.f32 %v2797_v8, %v3436_v15  ;;  %v3464_v60 = vld [vmem:[%s4059_s1 + $0x360] sm:$0xff] }
  0xa7   :  { %v724_v48 = vadd.f32 %v723_v43, %v722_v5  ;;  %v781_v3 = vadd.f32 %v780_v29, %v779_v46  ;;  %v915_v0 = vadd.f32 %v914_v19, %v913_v39  ;;  %v875_v52 = vmul.f32 %v2804_v10, %v3339_v31 }
  0xa8   :  { %v918_v11 = vsel %vm178_vm1, %v847_v61, 0.0  ;;  %v972_v7 = vsel %vm178_vm1, %v871_v38, 0.0  ;;  %v973_v17 = vsel %vm178_vm1, %v872_v23, 0.0  ;;  %v876_v63 = vmul.f32 %v2825_v53, %v3359_v28 }
  0xa9   :  { %v725_v42 = vrot.slane %v724_v48, 4  ;;  %v783_v26 = vadd.f32 %v782_v12, %v781_v3  ;;  %v917_v43 = vadd.f32 %v916_v6, %v915_v0  ;;  %v974_v29 = vadd.f32 %v973_v17, %v972_v7  ;;  %v3474_v3 = vld [vmem:[%s4059_s1 + $0x368] sm:$0xff]  ;;  %v3501_v17 = vld [vmem:[%s4059_s1 + $0x378] sm:$0xff] }
  0xaa   :  { %v920_v31 = vsel %vm178_vm1, %v848_v58, 0.0  ;;  %v975_v61 = vsel %vm178_vm1, %v873_v62, 0.0  ;;  %v977_v38 = vsel %vm178_vm1, %v874_v30, 0.0  ;;  %v851_v46 = vmul.f32 %v2834_v18, %v3464_v60 }
  0xab   :  { %v726_v19 = vadd.f32 %v725_v42, %v724_v48  ;;  %v785_v23 = vadd.f32 %v784_v32, %v783_v26  ;;  %v919_v12 = vadd.f32 %v918_v11, %v917_v43  ;;  %v976_v5 = vadd.f32 %v975_v61, %v974_v29  ;;  %v3485_v32 = vld [vmem:[%s4059_s1 + $0x370] sm:$0xff]  ;;  %v3518_v61 = vld [vmem:[%s4059_s1 + $0x380] sm:$0xff] }
  0xac   :  { %v877_v28 = vmul.f32 %v2846_v50, %v3376_v24  ;;  %v922_v58 = vsel %vm178_vm1, %v849_v40, 0.0  ;;  %v979_v39 = vsel %vm178_vm1, %v875_v52, 0.0  ;;  %v852_v0 = vmul.f32 %v2855_v49, %v3474_v3  ;;  %v3492_v24 = vld [vmem:[%s4058_s0 + $0x138] sm:$0xff] }
  0xad   :  { %v727_v62 = vrot.slane %v726_v19, 2  ;;  %v787_v30 = vadd.f32 %v786_v35, %v785_v23  ;;  %v921_v6 = vadd.f32 %v920_v31, %v919_v12  ;;  %v978_v48 = vadd.f32 %v977_v38, %v976_v5  ;;  %4327 = vst [vmem:[#allocation40_spill] sm:$0xff] %v3492_v24  ;;  %v800_v23 = vld [vmem:[#allocation2 + $0x2] sm:$0x1] }
  0xae   :  { %v878_v40 = vmul.f32 %v3492_v24, %v3395_v22  ;;  %v924_v35 = vsel %vm178_vm1, %v850_v36, 0.0  ;;  %v981_v52 = vsel %vm178_vm1, %v876_v63, 0.0  ;;  %v853_v43 = vmul.f32 %v2872_v47, %v3485_v32  ;;  %v3508_v22 = vld [vmem:[%s4058_s0 + $0x140] sm:$0xff] }
  0xaf   :  { %v728_v11 = vadd.f32 %v727_v62, %v726_v19  ;;  %v789_v7 = vadd.f32 %v788_v34, %v787_v30  ;;  %v923_v42 = vadd.f32 %v922_v58, %v921_v6  ;;  %v980_v26 = vadd.f32 %v979_v39, %v978_v48  ;;  %4328 = vst [vmem:[#allocation42_spill] sm:$0xff] %v3508_v22  ;;  %v3535_v39 = vld [vmem:[%s4059_s1 + $0x388] sm:$0xff]  ;;  %v3540_v6 = vld [vmem:[%s4059_s1 + $0x390] sm:$0xff] }
  0xb0   :  { %v879_v36 = vmul.f32 %v3508_v22, %v3409_v33  ;;  %v926_v34 = vsel %vm178_vm1, %v851_v46, 0.0  ;;  %v983_v29 = vsel %vm178_vm1, %v877_v28, 0.0  ;;  %v854_v12 = vmul.f32 %v2894_v25, %v3501_v17  ;;  %v3525_v33 = vld [vmem:[%s4058_s0 + $0x148] sm:$0xff]  ;;  %v3547_v48 = vld [vmem:[%s4058_s0 + $0x150] sm:$0xff] }
  0xb1   :  { %v729_v63 = vrot.slane %v728_v11, 1  ;;  %v791_v31 = vadd.f32 %v3414_v16, %v789_v7  ;;  %v925_v38 = vadd.f32 %v924_v35, %v923_v42  ;;  %v982_v19 = vadd.f32 %v981_v52, %v980_v26  ;;  %4329 = vst [vmem:[#allocation47_spill] sm:$0xff] %v3525_v33  ;;  %4330 = vst [vmem:[#allocation48_spill] sm:$0xff] %v3547_v48  ;;  %v3561_v26 = vld [vmem:[%s4059_s1 + $0x3a0] sm:$0xff] }
  0xb2   :  { %v880_v5 = vmul.f32 %v3525_v33, %v3419_v9  ;;  %v928_v16 = vsel %vm178_vm1, %v852_v0, 0.0  ;;  %v985_v46 = vsel %vm178_vm1, %v878_v40, 0.0  ;;  %v855_v9 = vmul.f32 %v2916_v51, %v3518_v61  ;;  %v4345_v51 = vld [vmem:[#allocation20_spill] sm:$0xff] }
  0xb3   :  { %v730_v28 = vadd.f32 %v729_v63, %v728_v11  ;;  %v793_v58 = vadd.f32 %v3426_v14, %v791_v31  ;;  %v927_v62 = vadd.f32 %v926_v34, %v925_v38  ;;  %v984_v30 = vadd.f32 %v983_v29, %v982_v19  ;;  %v3556_v11 = vld [vmem:[%s4059_s1 + $0x398] sm:$0xff]  ;;  %v3578_v31 = vld [vmem:[%s4059_s1 + $0x3a8] sm:$0xff] }
  0xb4   :  { %v881_v14 = vmul.f32 %v3547_v48, %v3431_v44  ;;  %v930_v0 = vsel %vm178_vm1, %v853_v43, 0.0  ;;  %v987_v40 = vsel %vm178_vm1, %v879_v36, 0.0  ;;  %v856_v44 = vmul.f32 %v2923_v20, %v3535_v39  ;;  %v3568_v43 = vld [vmem:[%s4058_s0 + $0x158] sm:$0xff] }
  0xb5   :  { %v794_v35 = vrot.slane %v793_v58, 4  ;;  %v802_v52 = vadd.f32 %v800_v23, %v730_v28  ;;  %v929_v7 = vadd.f32 %v928_v16, %v927_v62  ;;  %v986_v42 = vadd.f32 %v985_v46, %v984_v30  ;;  %4331 = vst [vmem:[#allocation49_spill] sm:$0xff] %v3568_v43  ;;  %v3601_v62 = vld [vmem:[%s4059_s1 + $0x3b8] sm:$0xff]  ;;  %v4333_v30 = vld [vmem:[#allocation9_spill] sm:$0xff] }
  0xb6   :  { %v882_v36 = vmul.f32 %v3568_v43, %v3436_v15  ;;  %v932_v34 = vsel %vm178_vm1, %v854_v12, 0.0  ;;  %v989_v29 = vsel %vm178_vm1, %v880_v5, 0.0  ;;  %v857_v38 = vmul.f32 %v2944_v45, %v3540_v6  ;;  %v3585_v15 = vld [vmem:[%s4059_s1 + $0x3b0] sm:$0xff]  ;;  %v3592_v5 = vld [vmem:[%s4058_s0 + $0x160] sm:$0xff]  ;;  %v801_v43 = vld [vmem:[#allocation2 + $0xa] sm:$0x1] }
  0xb7   :  { %v795_v63 = vadd.f32 %v794_v35, %v793_v58  ;;  %804 = vst.msk [vmem:[#allocation2 + $0x2] sm:$0x1] %vm321_vm2, %v802_v52  ;;  %v931_v19 = vadd.f32 %v930_v0, %v929_v7  ;;  %v988_v23 = vadd.f32 %v987_v40, %v986_v42  ;;  %v858_v12 = vmul.f32 %v2951_v41, %v3556_v11  ;;  %v3608_v52 = vld [vmem:[%s4059_s1 + $0x3c0] sm:$0xff] }
  0xb8   :  { %4332 = vst [vmem:[#allocation50_spill] sm:$0xff] %v3592_v5  ;;  %v883_v16 = vmul.f32 %v3592_v5, %v3464_v60  ;;  %v934_v46 = vsel %vm178_vm1, %v855_v9, 0.0  ;;  %v991_v28 = vsel %vm178_vm1, %v881_v14, 0.0  ;;  %v859_v0 = vmul.f32 %v4333_v30, %v3561_v26  ;;  %v4334_v60 = vld [vmem:[#allocation10_spill] sm:$0xff]  ;;  %v1390_v5 = vld [vmem:[%s4059_s1 + $0x3d0] sm:$0xff] }
  0xb9   :  { %v796_v58 = vrot.slane %v795_v63, 2  ;;  %v933_v40 = vadd.f32 %v932_v34, %v931_v19  ;;  %v990_v35 = vadd.f32 %v989_v29, %v988_v23  ;;  %v860_v9 = vmul.f32 %v4334_v60, %v3578_v31  ;;  %v3615_v14 = vld [vmem:[%s4058_s0 + $0x168] sm:$0xff] }
  0xba   :  { %4335 = vst [vmem:[#allocation51_spill] sm:$0xff] %v3615_v14  ;;  %v884_v7 = vmul.f32 %v3615_v14, %v3474_v3  ;;  %v936_v42 = vsel %vm178_vm1, %v856_v44, 0.0  ;;  %v993_v34 = vsel %vm178_vm1, %v882_v36, 0.0  ;;  %v1389_v19 = vld [vmem:[%s4059_s1 + $0x3c8] sm:$0xff]  ;;  %v4337_v3 = vld [vmem:[#allocation17_spill] sm:$0xff]  ;;  %v4338_v44 = vld [vmem:[#allocation23_spill] sm:$0xff]  ;;  %v888_v25 = vmul.f32 %v3154_v1, %v3535_v39 }
  0xbb   :  { %v797_v29 = vadd.f32 %v796_v58, %v795_v63  ;;  %v4336_v23 = vld [vmem:[#allocation14_spill] sm:$0xff]  ;;  %v935_v30 = vadd.f32 %v934_v46, %v933_v40  ;;  %v992_v41 = vadd.f32 %v991_v28, %v990_v35  ;;  %v862_v14 = vmul.f32 %v4337_v3, %v3601_v62  ;;  %v1391_v46 = vld [vmem:[%s4059_s1 + $0x3d8] sm:$0xff]  ;;  %v1392_v3 = vld [vmem:[%s4059_s1 + $0x3e0] sm:$0xff] }
  0xbc   :  { %v861_v60 = vmul.f32 %v4336_v23, %v3585_v15  ;;  %v885_v36 = vmul.f32 %v4338_v44, %v3485_v32  ;;  %v938_v63 = vsel %vm178_vm1, %v857_v38, 0.0  ;;  %v995_v58 = vsel %vm178_vm1, %v883_v16, 0.0  ;;  %v4339_v28 = vld [vmem:[#allocation18_spill] sm:$0xff]  ;;  %v4340_v32 = vld [vmem:[#allocation15_spill] sm:$0xff] }
  0xbd   :  { %v798_v45 = vrot.slane %v797_v29, 1  ;;  %v863_v40 = vmul.f32 %v4339_v28, %v3608_v52  ;;  %v937_v35 = vadd.f32 %v936_v42, %v935_v30  ;;  %v994_v23 = vadd.f32 %v993_v34, %v992_v41  ;;  %v1393_v30 = vld [vmem:[%s4059_s1 + $0x3e8] sm:$0xff]  ;;  %v4341_v41 = vld [vmem:[#allocation16_spill] sm:$0xff] }
  0xbe   :  { %v864_v44 = vmul.f32 %v4340_v32, %v1389_v19  ;;  %v886_v38 = vmul.f32 %v3099_v57, %v3501_v17  ;;  %v940_v16 = vsel %vm178_vm1, %v858_v12, 0.0  ;;  %v997_v20 = vsel %vm178_vm1, %v884_v7, 0.0  ;;  %v1394_v32 = vld [vmem:[%s4059_s1 + $0x3f0] sm:$0xff]  ;;  %v1395_v17 = vld [vmem:[%s4059_s1 + $0x3f8] sm:$0xff] }
  0xbf   :  { %v799_v48 = vadd.f32 %v798_v45, %v797_v29  ;;  %v865_v42 = vmul.f32 %v4341_v41, %v1390_v5  ;;  %v939_v34 = vadd.f32 %v938_v63, %v937_v35  ;;  %v996_v28 = vadd.f32 %v995_v58, %v994_v23  ;;  %v4342_v12 = vld [vmem:[#allocation27_spill] sm:$0xff]  ;;  %v4343_v45 = vld [vmem:[#allocation21_spill] sm:$0xff] }
  0xc0   :  { %v866_v57 = vmul.f32 %v4342_v12, %v1391_v46  ;;  %v887_v7 = vmul.f32 %v4343_v45, %v3518_v61  ;;  %v942_v29 = vsel %vm178_vm1, %v859_v0, 0.0  ;;  %v999_v33 = vsel %vm178_vm1, %v885_v36, 0.0  ;;  %v4344_v63 = vld [vmem:[#allocation31_spill] sm:$0xff]  ;;  %v4347_v45 = vld [vmem:[#allocation38_spill] sm:$0xff] }
  0xc1   :  { %v803_v41 = vadd.f32 %v801_v43, %v799_v48  ;;  %v867_v23 = vmul.f32 %v4344_v63, %v1392_v3  ;;  %v941_v58 = vadd.f32 %v940_v16, %v939_v34  ;;  %v998_v35 = vadd.f32 %v997_v20, %v996_v28  ;;  %v4346_v61 = vld [vmem:[#allocation35_spill] sm:$0xff]  ;;  %v4354_v63 = vld [vmem:[#allocation26_spill] sm:$0xff] }
  0xc2   :  { %v868_v22 = vmul.f32 %v4345_v51, %v1393_v30  ;;  %v944_v24 = vsel %vm178_vm1, %v860_v9, 0.0  ;;  %v1001_v12 = vsel %vm178_vm1, %v886_v38, 0.0  ;;  %v869_v0 = vmul.f32 %v4346_v61, %v1394_v32  ;;  %v4348_v51 = vld [vmem:[#allocation22_spill] sm:$0xff]  ;;  %v4349_v38 = vld [vmem:[#allocation41_spill] sm:$0xff] }
  0xc3   :  { %805 = vst.msk [vmem:[#allocation2 + $0xa] sm:$0x1] %vm321_vm2, %v803_v41  ;;  %v870_v36 = vmul.f32 %v4347_v45, %v1395_v17  ;;  %v943_v48 = vadd.f32 %v942_v29, %v941_v58  ;;  %v1000_v43 = vadd.f32 %v999_v33, %v998_v35  ;;  %v889_v20 = vmul.f32 %v3161_v55, %v3540_v6  ;;  %v4350_v41 = vld [vmem:[#allocation24_spill] sm:$0xff]  ;;  %v4351_v33 = vld [vmem:[#allocation43_spill] sm:$0xff]  ;;  %v4352_v6 = vld [vmem:[#allocation25_spill] sm:$0xff] }
  0xc4   :  { %v890_v28 = vmul.f32 %v4348_v51, %v3556_v11  ;;  %v946_v39 = vsel %vm178_vm1, %v861_v60, 0.0  ;;  %v1003_v9 = vsel %vm178_vm1, %v887_v7, 0.0  ;;  %v891_v16 = vmul.f32 %v4349_v38, %v3561_v26  ;;  %v4353_v7 = vld [vmem:[#allocation44_spill] sm:$0xff] }
  0xc5   :  { %v892_v34 = vmul.f32 %v4350_v41, %v3578_v31  ;;  %v945_v61 = vadd.f32 %v944_v24, %v943_v48  ;;  %v1002_v45 = vadd.f32 %v1001_v12, %v1000_v43  ;;  %v893_v29 = vmul.f32 %v4351_v33, %v3585_v15  ;;  %v4355_v31 = vld [vmem:[#allocation28_spill] sm:$0xff]  ;;  %v4356_v12 = vld [vmem:[#allocation29_spill] sm:$0xff] }
  0xc6   :  { %v894_v58 = vmul.f32 %v4352_v6, %v3601_v62  ;;  %v948_v11 = vsel %vm178_vm1, %v862_v14, 0.0  ;;  %v1005_v60 = vsel %vm178_vm1, %v888_v25, 0.0  ;;  %v895_v35 = vmul.f32 %v4353_v7, %v3608_v52  ;;  %v3698_v62 = vld [vmem:[%s4059_s1 + $0x400] sm:$0xff]  ;;  %v3703_v25 = vld [vmem:[%s4059_s1 + $0x408] sm:$0xff] }
  0xc7   :  { %v896_v26 = vmul.f32 %v4354_v63, %v1389_v19  ;;  %v947_v38 = vadd.f32 %v946_v39, %v945_v61  ;;  %v1004_v51 = vadd.f32 %v1003_v9, %v1002_v45  ;;  %v897_v24 = vmul.f32 %v4355_v31, %v1390_v5  ;;  %v4357_v52 = vld [vmem:[#allocation30_spill] sm:$0xff]  ;;  %v4358_v19 = vld [vmem:[#allocation32_spill] sm:$0xff]  ;;  %v4360_v61 = vld [vmem:[#allocation33_spill] sm:$0xff] }
  0xc8   :  { %v898_v48 = vmul.f32 %v4356_v12, %v1391_v46  ;;  %v950_v15 = vsel %vm178_vm1, %v863_v40, 0.0  ;;  %v1007_v43 = vsel %vm178_vm1, %v889_v20, 0.0  ;;  %v899_v14 = vmul.f32 %v4357_v52, %v1392_v3  ;;  %v3710_v40 = vld [vmem:[%s4059_s1 + $0x410] sm:$0xff]  ;;  %v4359_v20 = vld [vmem:[#allocation45_spill] sm:$0xff]  ;;  %v3719_v3 = vld [vmem:[%s4059_s1 + $0x418] sm:$0xff] }
  0xc9   :  { %v900_v5 = vmul.f32 %v4358_v19, %v1393_v30  ;;  %v949_v39 = vadd.f32 %v948_v11, %v947_v38  ;;  %v1006_v46 = vadd.f32 %v1005_v60, %v1004_v51  ;;  %v901_v9 = vmul.f32 %v4359_v20, %v1394_v32  ;;  %v3724_v38 = vld [vmem:[%s4059_s1 + $0x420] sm:$0xff]  ;;  %v4361_v32 = vld [vmem:[#allocation34_spill] sm:$0xff] }
  0xca   :  { %v902_v45 = vmul.f32 %v4360_v61, %v1395_v17  ;;  %v952_v12 = vsel %vm178_vm1, %v864_v44, 0.0  ;;  %v1009_v31 = vsel %vm178_vm1, %v890_v28, 0.0  ;;  %v1080_v11 = vmul.f32 %v4361_v32, %v3698_v62  ;;  %v4362_v17 = vld [vmem:[#allocation36_spill] sm:$0xff]  ;;  %v4364_v20 = vld [vmem:[#allocation46_spill] sm:$0xff] }
  0xcb   :  { %v951_v30 = vadd.f32 %v950_v15, %v949_v39  ;;  %v1008_v51 = vadd.f32 %v1007_v43, %v1006_v46  ;;  %v1081_v44 = vmul.f32 %v4362_v17, %v3703_v25  ;;  %v954_v28 = vsel %vm178_vm1, %v865_v42, 0.0  ;;  %v4363_v15 = vld [vmem:[#allocation37_spill] sm:$0xff] }
  0xcc   :  { %v956_v60 = vsel %vm178_vm1, %v866_v57, 0.0  ;;  %v1011_v52 = vsel %vm178_vm1, %v891_v16, 0.0  ;;  %v1082_v43 = vmul.f32 %v4363_v15, %v3710_v40  ;;  %v958_v39 = vsel %vm178_vm1, %v867_v23, 0.0  ;;  %v3744_v57 = vld [vmem:[%s4059_s1 + $0x428] sm:$0xff]  ;;  %v4365_v16 = vld [vmem:[#allocation39_spill] sm:$0xff] }
  0xcd   :  { %v953_v19 = vadd.f32 %v952_v12, %v951_v30  ;;  %v1010_v46 = vadd.f32 %v1009_v31, %v1008_v51  ;;  %v1083_v61 = vmul.f32 %v4364_v20, %v3719_v3  ;;  %v960_v32 = vsel %vm178_vm1, %v868_v22, 0.0 }
  0xce   :  { %v962_v17 = vsel %vm178_vm1, %v869_v0, 0.0  ;;  %v1013_v42 = vsel %vm178_vm1, %v892_v34, 0.0  ;;  %v1084_v12 = vmul.f32 %v4365_v16, %v3724_v38  ;;  %v1144_v31 = vsel %vm178_vm1, %v1080_v11, 0.0  ;;  %v3755_v34 = vld [vmem:[%s4059_s1 + $0x430] sm:$0xff] }
  0xcf   :  { %v955_v30 = vadd.f32 %v954_v28, %v953_v19  ;;  %v1012_v23 = vadd.f32 %v1011_v52, %v1010_v46  ;;  %v1145_v51 = vsel %vm178_vm1, %v1081_v44, 0.0  ;;  %v964_v22 = vsel %vm178_vm1, %v870_v36, 0.0  ;;  %v3767_v52 = vld [vmem:[%s4059_s1 + $0x438] sm:$0xff] }
  0xd0   :  { %v1015_v0 = vsel %vm178_vm1, %v893_v29, 0.0  ;;  %v1146_v15 = vadd.f32 %v1145_v51, %v1144_v31  ;;  %v1147_v20 = vsel %vm178_vm1, %v1082_v43, 0.0  ;;  %v1085_v28 = vmul.f32 %v3385_v13, %v3744_v57 }
  0xd1   :  { %v957_v63 = vadd.f32 %v956_v60, %v955_v30  ;;  %v1014_v16 = vadd.f32 %v1013_v42, %v1012_v23  ;;  %v1149_v11 = vsel %vm178_vm1, %v1083_v61, 0.0  ;;  %v1017_v44 = vsel %vm178_vm1, %v894_v58, 0.0 }
  0xd2   :  { %v1019_v36 = vsel %vm178_vm1, %v895_v35, 0.0  ;;  %v1021_v29 = vsel %vm178_vm1, %v896_v26, 0.0  ;;  %v1148_v19 = vadd.f32 %v1147_v20, %v1146_v15  ;;  %v1086_v46 = vmul.f32 %v2707_v59, %v3755_v34  ;;  %v3778_v26 = vld [vmem:[%s4059_s1 + $0x440] sm:$0xff] }
  0xd3   :  { %v959_v43 = vadd.f32 %v958_v39, %v957_v63  ;;  %v1016_v60 = vadd.f32 %v1015_v0, %v1014_v16  ;;  %v1151_v13 = vsel %vm178_vm1, %v1084_v12, 0.0  ;;  %v1023_v61 = vsel %vm178_vm1, %v897_v24, 0.0 }
  0xd4   :  { %v1025_v58 = vsel %vm178_vm1, %v898_v48, 0.0  ;;  %v1027_v35 = vsel %vm178_vm1, %v899_v14, 0.0  ;;  %v1150_v42 = vadd.f32 %v1149_v11, %v1148_v19  ;;  %v1087_v39 = vmul.f32 %v2725_v21, %v3767_v52  ;;  %v3791_v14 = vld [vmem:[%s4059_s1 + $0x448] sm:$0xff]  ;;  %v3796_v21 = vld [vmem:[%s4059_s1 + $0x450] sm:$0xff] }
  0xd5   :  { %v961_v30 = vadd.f32 %v960_v32, %v959_v43  ;;  %v1018_v63 = vadd.f32 %v1017_v44, %v1016_v60  ;;  %v1153_v59 = vsel %vm178_vm1, %v1085_v28, 0.0  ;;  %v1029_v12 = vsel %vm178_vm1, %v900_v5, 0.0  ;;  %v3801_v5 = vld [vmem:[%s4059_s1 + $0x458] sm:$0xff]  ;;  %v3835_v43 = vld [vmem:[%s4059_s1 + $0x468] sm:$0xff] }
  0xd6   :  { %v1031_v24 = vsel %vm178_vm1, %v901_v9, 0.0  ;;  %v3786_v48 = vsel %vm178_vm1, %v902_v45, 0.0  ;;  %v1152_v23 = vadd.f32 %v1151_v13, %v1150_v42  ;;  %v1088_v9 = vmul.f32 %v2741_v54, %v3778_v26 }
  0xd7   :  { %v963_v32 = vadd.f32 %v962_v17, %v961_v30  ;;  %v1020_v31 = vadd.f32 %v1019_v36, %v1018_v63  ;;  %v1155_v45 = vsel %vm178_vm1, %v1086_v46, 0.0  ;;  %v1112_v51 = vmul.f32 %v2753_v2, %v3698_v62  ;;  %v4366_v17 = vld [vmem:[#allocation6_spill] sm:$0xff] }
  0xd8   :  { %v1113_v0 = vmul.f32 %v4366_v17, %v3703_v25  ;;  %v1114_v15 = vmul.f32 %v2775_v37, %v3710_v40  ;;  %v1154_v20 = vadd.f32 %v1153_v59, %v1152_v23  ;;  %v1089_v11 = vmul.f32 %v2768_v4, %v3791_v14  ;;  %v3824_v40 = vld [vmem:[%s4059_s1 + $0x460] sm:$0xff] }
  0xd9   :  { %v965_v16 = vadd.f32 %v964_v22, %v963_v32  ;;  %v1022_v28 = vadd.f32 %v1021_v29, %v1020_v31  ;;  %v1157_v44 = vsel %vm178_vm1, %v1087_v39, 0.0  ;;  %v1090_v54 = vmul.f32 %v2782_v27, %v3796_v21 }
  0xda   :  { %v1091_v2 = vmul.f32 %v2797_v8, %v3801_v5  ;;  %v1115_v62 = vmul.f32 %v2789_v56, %v3719_v3  ;;  %v1156_v25 = vadd.f32 %v1155_v45, %v1154_v20  ;;  %v1116_v4 = vmul.f32 %v2804_v10, %v3724_v38 }
  0xdb   :  { %v966_v36 = vrot.slane %v965_v16, 4  ;;  %v1024_v37 = vadd.f32 %v1023_v61, %v1022_v28  ;;  %v1159_v22 = vsel %vm178_vm1, %v1088_v9, 0.0  ;;  %v1213_v29 = vsel %vm178_vm1, %v1112_v51, 0.0  ;;  %v4368_v28 = vld [vmem:[#allocation7_spill] sm:$0xff] }
  0xdc   :  { %v1158_v27 = vadd.f32 %v1157_v44, %v1156_v25  ;;  %v1214_v8 = vsel %vm178_vm1, %v1113_v0, 0.0  ;;  %v1216_v56 = vsel %vm178_vm1, %v1114_v15, 0.0  ;;  %v1161_v60 = vsel %vm178_vm1, %v1089_v11, 0.0  ;;  %v4369_v11 = vld [vmem:[#allocation42_spill] sm:$0xff] }
  0xdd   :  { %v967_v3 = vadd.f32 %v966_v36, %v965_v16  ;;  %v1026_v19 = vadd.f32 %v1025_v58, %v1024_v37  ;;  %v1215_v46 = vadd.f32 %v1214_v8, %v1213_v29  ;;  %v1092_v10 = vmul.f32 %v2834_v18, %v3824_v40  ;;  %v3846_v58 = vld [vmem:[%s4059_s1 + $0x470] sm:$0xff]  ;;  %v1041_v16 = vld [vmem:[#allocation2 + $0x3] sm:$0x1]  ;;  %v3881_v36 = vld [vmem:[%s4059_s1 + $0x488] sm:$0xff] }
  0xde   :  { %v1117_v38 = vmul.f32 %v2825_v53, %v3744_v57  ;;  %v1160_v13 = vadd.f32 %v1159_v22, %v1158_v27  ;;  %v1218_v61 = vsel %vm178_vm1, %v1115_v62, 0.0  ;;  %v1163_v63 = vsel %vm178_vm1, %v1090_v54, 0.0  ;;  %v4370_v37 = vld [vmem:[#allocation8_spill] sm:$0xff]  ;;  %v4371_v22 = vld [vmem:[#allocation47_spill] sm:$0xff] }
  0xdf   :  { %v968_v42 = vrot.slane %v967_v3, 2  ;;  %v1028_v30 = vadd.f32 %v1027_v35, %v1026_v19  ;;  %v1217_v39 = vadd.f32 %v1216_v56, %v1215_v46  ;;  %v1093_v59 = vmul.f32 %v2855_v49, %v3835_v43  ;;  %v3857_v35 = vld [vmem:[%s4059_s1 + $0x478] sm:$0xff]  ;;  %v3892_v19 = vld [vmem:[%s4059_s1 + $0x490] sm:$0xff] }
  0xe0   :  { %v1118_v18 = vmul.f32 %v2846_v50, %v3755_v34  ;;  %v1162_v53 = vadd.f32 %v1161_v60, %v1160_v13  ;;  %v1220_v57 = vsel %vm178_vm1, %v1116_v4, 0.0  ;;  %v1165_v31 = vsel %vm178_vm1, %v1091_v2, 0.0  ;;  %v4367_v49 = vld [vmem:[#allocation40_spill] sm:$0xff]  ;;  %v4373_v13 = vld [vmem:[#allocation11_spill] sm:$0xff] }
  0xe1   :  { %v969_v23 = vadd.f32 %v968_v42, %v967_v3  ;;  %v1030_v32 = vadd.f32 %v1029_v12, %v1028_v30  ;;  %v1219_v9 = vadd.f32 %v1218_v61, %v1217_v39  ;;  %v1094_v45 = vmul.f32 %v2872_v47, %v3846_v58  ;;  %v3868_v12 = vld [vmem:[%s4059_s1 + $0x480] sm:$0xff]  ;;  %v4372_v60 = vld [vmem:[#allocation48_spill] sm:$0xff] }
  0xe2   :  { %v1119_v51 = vmul.f32 %v4367_v49, %v3767_v52  ;;  %v1164_v50 = vadd.f32 %v1163_v63, %v1162_v53  ;;  %v1222_v34 = vsel %vm178_vm1, %v1117_v38, 0.0  ;;  %v1167_v15 = vsel %vm178_vm1, %v1092_v10, 0.0  ;;  %v3904_v63 = vld [vmem:[%s4059_s1 + $0x498] sm:$0xff]  ;;  %v4374_v39 = vld [vmem:[#allocation49_spill] sm:$0xff] }
  0xe3   :  { %v970_v17 = vrot.slane %v969_v23, 1  ;;  %v1032_v0 = vadd.f32 %v1031_v24, %v1030_v32  ;;  %v1221_v20 = vadd.f32 %v1220_v57, %v1219_v9  ;;  %v1095_v47 = vmul.f32 %v4368_v28, %v3857_v35  ;;  %v4375_v57 = vld [vmem:[#allocation12_spill] sm:$0xff]  ;;  %v3915_v9 = vld [vmem:[%s4059_s1 + $0x4a0] sm:$0xff] }
  0xe4   :  { %v1120_v52 = vmul.f32 %v4369_v11, %v3778_v26  ;;  %v1166_v44 = vadd.f32 %v1165_v31, %v1164_v50  ;;  %v1224_v54 = vsel %vm178_vm1, %v1118_v18, 0.0  ;;  %v1169_v62 = vsel %vm178_vm1, %v1093_v59, 0.0 }
  0xe5   :  { %v971_v2 = vadd.f32 %v970_v17, %v969_v23  ;;  %v1034_v24 = vadd.f32 %v3786_v48, %v1032_v0  ;;  %v1223_v25 = vadd.f32 %v1222_v34, %v1221_v20  ;;  %v1096_v4 = vmul.f32 %v4370_v37, %v3868_v12  ;;  %v4377_v34 = vld [vmem:[#allocation13_spill] sm:$0xff]  ;;  %v1417_v20 = vld [vmem:[%s4059_s1 + $0x4a8] sm:$0xff] }
  0xe6   :  { %v1121_v26 = vmul.f32 %v4371_v22, %v3791_v14  ;;  %v1168_v27 = vadd.f32 %v1167_v15, %v1166_v44  ;;  %v1226_v29 = vsel %vm178_vm1, %v1119_v51, 0.0  ;;  %v1171_v48 = vsel %vm178_vm1, %v1094_v45, 0.0  ;;  %v4376_v45 = vld [vmem:[#allocation50_spill] sm:$0xff] }
  0xe7   :  { %v1035_v8 = vrot.slane %v1034_v24, 4  ;;  %v1043_v56 = vadd.f32 %v1041_v16, %v971_v2  ;;  %v1225_v3 = vadd.f32 %v1224_v54, %v1223_v25  ;;  %v1122_v46 = vmul.f32 %v4372_v60, %v3796_v21  ;;  %v4378_v16 = vld [vmem:[#allocation51_spill] sm:$0xff] }
  0xe8   :  { %v1170_v10 = vadd.f32 %v1169_v62, %v1168_v27  ;;  %v1228_v38 = vsel %vm178_vm1, %v1120_v52, 0.0  ;;  %v1097_v61 = vmul.f32 %v4373_v13, %v3881_v36  ;;  %v1173_v42 = vsel %vm178_vm1, %v1095_v47, 0.0  ;;  %v4379_v52 = vld [vmem:[#allocation9_spill] sm:$0xff]  ;;  %v1418_v62 = vld [vmem:[%s4059_s1 + $0x4b0] sm:$0xff] }
  0xe9   :  { %v1036_v14 = vadd.f32 %v1035_v8, %v1034_v24  ;;  %1045 = vst.msk [vmem:[#allocation2 + $0x3] sm:$0x1] %vm321_vm2, %v1043_v56  ;;  %v1227_v30 = vadd.f32 %v1226_v29, %v1225_v3  ;;  %v1123_v21 = vmul.f32 %v4374_v39, %v3801_v5  ;;  %v1230_v18 = vsel %vm178_vm1, %v1121_v26, 0.0  ;;  %v1042_v24 = vld [vmem:[#allocation2 + $0xb] sm:$0x1]  ;;  %v4380_v25 = vld [vmem:[#allocation23_spill] sm:$0xff] }
  0xea   :  { %v1172_v59 = vadd.f32 %v1171_v48, %v1170_v10  ;;  %v1098_v23 = vmul.f32 %v4375_v57, %v3892_v19  ;;  %v1175_v32 = vsel %vm178_vm1, %v1096_v4, 0.0  ;;  %v1124_v49 = vmul.f32 %v4376_v45, %v3824_v40  ;;  %v4381_v26 = vld [vmem:[#allocation10_spill] sm:$0xff]  ;;  %v1419_v56 = vld [vmem:[%s4059_s1 + $0x4b8] sm:$0xff]  ;;  %v4382_v48 = vld [vmem:[#allocation19_spill] sm:$0xff] }
  0xeb   :  { %v1037_v53 = vrot.slane %v1036_v14, 2  ;;  %v1229_v31 = vadd.f32 %v1228_v38, %v1227_v30  ;;  %v1232_v5 = vsel %vm178_vm1, %v1122_v46, 0.0  ;;  %v1099_v17 = vmul.f32 %v4377_v34, %v3904_v63  ;;  %v4383_v10 = vld [vmem:[#allocation14_spill] sm:$0xff] }
  0xec   :  { %v1174_v51 = vadd.f32 %v1173_v42, %v1172_v59  ;;  %v1177_v0 = vsel %vm178_vm1, %v1097_v61, 0.0  ;;  %v1125_v28 = vmul.f32 %v4378_v16, %v3835_v43  ;;  %v1234_v40 = vsel %vm178_vm1, %v1123_v21, 0.0  ;;  %v1420_v61 = vld [vmem:[%s4059_s1 + $0x4c0] sm:$0xff]  ;;  %v1421_v57 = vld [vmem:[%s4059_s1 + $0x4c8] sm:$0xff]  ;;  %v1423_v16 = vld [vmem:[%s4059_s1 + $0x4d8] sm:$0xff] }
  0xed   :  { %v1038_v50 = vadd.f32 %v1037_v53, %v1036_v14  ;;  %v1231_v15 = vadd.f32 %v1230_v18, %v1229_v31  ;;  %v1100_v44 = vmul.f32 %v4379_v52, %v3915_v9  ;;  %v1179_v54 = vsel %vm178_vm1, %v1098_v23, 0.0  ;;  %v4384_v42 = vld [vmem:[#allocation21_spill] sm:$0xff]  ;;  %v4386_v31 = vld [vmem:[#allocation18_spill] sm:$0xff]  ;;  %v4389_v52 = vld [vmem:[#allocation16_spill] sm:$0xff] }
  0xee   :  { %v1176_v47 = vadd.f32 %v1175_v32, %v1174_v51  ;;  %v1126_v37 = vmul.f32 %v4380_v25, %v3846_v58  ;;  %v1236_v43 = vsel %vm178_vm1, %v1124_v49, 0.0  ;;  %v1101_v27 = vmul.f32 %v4381_v26, %v1417_v20  ;;  %v1425_v26 = vld [vmem:[%s4059_s1 + $0x4e8] sm:$0xff] }
  0xef   :  { %v1039_v11 = vrot.slane %v1038_v50, 1  ;;  %v1233_v2 = vadd.f32 %v1232_v5, %v1231_v15  ;;  %v1181_v29 = vsel %vm178_vm1, %v1099_v17, 0.0  ;;  %v1127_v3 = vmul.f32 %v4382_v48, %v3857_v35  ;;  %v4385_v35 = vld [vmem:[#allocation17_spill] sm:$0xff]  ;;  %v1422_v5 = vld [vmem:[%s4059_s1 + $0x4d0] sm:$0xff] }
  0xf0   :  { %v1178_v4 = vadd.f32 %v1177_v0, %v1176_v47  ;;  %v1238_v46 = vsel %vm178_vm1, %v1125_v28, 0.0  ;;  %v1102_v38 = vmul.f32 %v4383_v10, %v1418_v62  ;;  %v1183_v14 = vsel %vm178_vm1, %v1100_v44, 0.0  ;;  %v4387_v0 = vld [vmem:[#allocation15_spill] sm:$0xff]  ;;  %v4388_v28 = vld [vmem:[#allocation22_spill] sm:$0xff] }
  0xf1   :  { %v1040_v22 = vadd.f32 %v1039_v11, %v1038_v50  ;;  %v1235_v8 = vadd.f32 %v1234_v40, %v1233_v2  ;;  %v1128_v30 = vmul.f32 %v4384_v42, %v3868_v12  ;;  %v1240_v21 = vsel %vm178_vm1, %v1126_v37, 0.0  ;;  %v4390_v2 = vld [vmem:[#allocation41_spill] sm:$0xff]  ;;  %v4392_v48 = vld [vmem:[#allocation31_spill] sm:$0xff]  ;;  %v1427_v42 = vld [vmem:[%s4059_s1 + $0x4f8] sm:$0xff] }
  0xf2   :  { %v1180_v60 = vadd.f32 %v1179_v54, %v1178_v4  ;;  %v1103_v59 = vmul.f32 %v4385_v35, %v1419_v56  ;;  %v1185_v18 = vsel %vm178_vm1, %v1101_v27, 0.0  ;;  %v1129_v23 = vmul.f32 %v3154_v1, %v3881_v36  ;;  %v1424_v54 = vld [vmem:[%s4059_s1 + $0x4e0] sm:$0xff]  ;;  %v4391_v4 = vld [vmem:[#allocation27_spill] sm:$0xff] }
  0xf3   :  { %v1044_v58 = vadd.f32 %v1042_v24, %v1040_v22  ;;  %v1237_v13 = vadd.f32 %v1236_v43, %v1235_v8  ;;  %v1242_v12 = vsel %vm178_vm1, %v1127_v3, 0.0  ;;  %v1104_v45 = vmul.f32 %v4386_v31, %v1420_v61  ;;  %v4393_v31 = vld [vmem:[#allocation26_spill] sm:$0xff] }
  0xf4   :  { %v1182_v39 = vadd.f32 %v1181_v29, %v1180_v60  ;;  %v1187_v49 = vsel %vm178_vm1, %v1102_v38, 0.0  ;;  %v1130_v50 = vmul.f32 %v3161_v55, %v3892_v19  ;;  %v1244_v17 = vsel %vm178_vm1, %v1128_v30, 0.0 }
  0xf5   :  { %1046 = vst.msk [vmem:[#allocation2 + $0xb] sm:$0x1] %vm321_vm2, %v1044_v58  ;;  %v1239_v53 = vadd.f32 %v1238_v46, %v1237_v13  ;;  %v1105_v1 = vmul.f32 %v4387_v0, %v1421_v57  ;;  %v1189_v36 = vsel %vm178_vm1, %v1103_v59, 0.0  ;;  %v1131_v47 = vmul.f32 %v4388_v28, %v3904_v63  ;;  %v1426_v46 = vld [vmem:[%s4059_s1 + $0x4f0] sm:$0xff] }
  0xf6   :  { %v1184_v32 = vadd.f32 %v1183_v14, %v1182_v39  ;;  %v1246_v11 = vsel %vm178_vm1, %v1129_v23, 0.0  ;;  %v1106_v55 = vmul.f32 %v4389_v52, %v1422_v5  ;;  %v1191_v19 = vsel %vm178_vm1, %v1104_v45, 0.0 }
  0xf7   :  { %v1241_v51 = vadd.f32 %v1240_v21, %v1239_v53  ;;  %v1132_v24 = vmul.f32 %v4390_v2, %v3915_v9  ;;  %v1248_v37 = vsel %vm178_vm1, %v1130_v50, 0.0  ;;  %v1107_v63 = vmul.f32 %v4391_v4, %v1423_v16 }
  0xf8   :  { %v1186_v34 = vadd.f32 %v1185_v18, %v1184_v32  ;;  %v1193_v43 = vsel %vm178_vm1, %v1105_v1, 0.0  ;;  %v1133_v27 = vmul.f32 %v4350_v41, %v1417_v20  ;;  %v1250_v8 = vsel %vm178_vm1, %v1131_v47, 0.0  ;;  %v1493_v41 = vld [vmem:[%s4058_s0 + $0xe8] sm:$0xff] }
  0xf9   :  { %v1243_v15 = vadd.f32 %v1242_v12, %v1241_v51  ;;  %v1108_v3 = vmul.f32 %v4392_v48, %v1424_v54  ;;  %v1195_v9 = vsel %vm178_vm1, %v1106_v55, 0.0  ;;  %v1134_v58 = vmul.f32 %v4351_v33, %v1418_v62  ;;  %v1494_v62 = vld [vmem:[%s4058_s0 + $0xf0] sm:$0xff] }
  0xfa   :  { %v1188_v40 = vadd.f32 %v1187_v49, %v1186_v34  ;;  %v1252_v38 = vsel %vm178_vm1, %v1132_v24, 0.0  ;;  %v1109_v20 = vmul.f32 %v1493_v41, %v1425_v26  ;;  %v1197_v14 = vsel %vm178_vm1, %v1107_v63, 0.0 }
  0xfb   :  { %v1245_v44 = vadd.f32 %v1244_v17, %v1243_v15  ;;  %v1135_v30 = vmul.f32 %v4352_v6, %v1419_v56  ;;  %v1254_v33 = vsel %vm178_vm1, %v1133_v27, 0.0  ;;  %v1110_v21 = vmul.f32 %v1494_v62, %v1426_v46  ;;  %v1495_v6 = vld [vmem:[%s4058_s0 + $0xf8] sm:$0xff]  ;;  %v1283_v62 = vld [vmem:[#allocation2 + $0xc] sm:$0x1] }
  0xfc   :  { %v1190_v25 = vadd.f32 %v1189_v36, %v1188_v40  ;;  %v1199_v35 = vsel %vm178_vm1, %v1108_v3, 0.0  ;;  %v1136_v18 = vmul.f32 %v4353_v7, %v1420_v61  ;;  %v1256_v23 = vsel %vm178_vm1, %v1134_v58, 0.0  ;;  %v4394_v7 = vld [vmem:[#allocation28_spill] sm:$0xff] }
  0xfd   :  { %v1247_v22 = vadd.f32 %v1246_v11, %v1245_v44  ;;  %v1111_v56 = vmul.f32 %v1495_v6, %v1427_v42  ;;  %v1201_v32 = vsel %vm178_vm1, %v1109_v20, 0.0  ;;  %v1137_v45 = vmul.f32 %v4393_v31, %v1421_v57  ;;  %v1496_v15 = vld [vmem:[%s4058_s0 + $0x1d8] sm:$0xff]  ;;  %v1497_v11 = vld [vmem:[%s4058_s0 + $0x1e0] sm:$0xff]  ;;  %v1498_v44 = vld [vmem:[%s4058_s0 + $0x1e8] sm:$0xff] }
  0xfe   :  { %v1192_v29 = vadd.f32 %v1191_v19, %v1190_v25  ;;  %v1258_v51 = vsel %vm178_vm1, %v1135_v30, 0.0  ;;  %v1203_v50 = vsel %vm178_vm1, %v1110_v21, 0.0  ;;  %v1138_v61 = vmul.f32 %v4394_v7, %v1422_v5 }
  0xff   :  { %v1249_v60 = vadd.f32 %v1248_v37, %v1247_v22  ;;  %v1260_v0 = vsel %vm178_vm1, %v1136_v18, 0.0  ;;  %v1205_v1 = vsel %vm178_vm1, %v1111_v56, 0.0  ;;  %v1139_v28 = vmul.f32 %v1496_v15, %v1423_v16  ;;  %v1499_v37 = vld [vmem:[%s4058_s0 + $0x1f0] sm:$0xff]  ;;  %v1500_v22 = vld [vmem:[%s4058_s0 + $0x1f8] sm:$0xff] }
 0x100   :  { %v1194_v10 = vadd.f32 %v1193_v43, %v1192_v29  ;;  %v1262_v47 = vsel %vm178_vm1, %v1137_v45, 0.0  ;;  %v1140_v5 = vmul.f32 %v1497_v11, %v1424_v54  ;;  %v1264_v55 = vsel %vm178_vm1, %v1138_v61, 0.0 }
 0x101   :  { %v1251_v13 = vadd.f32 %v1250_v8, %v1249_v60  ;;  %v1141_v2 = vmul.f32 %v1498_v44, %v1425_v26  ;;  %v1266_v16 = vsel %vm178_vm1, %v1139_v28, 0.0  ;;  %v1142_v4 = vmul.f32 %v1499_v37, %v1426_v46 }
 0x102   :  { %v1196_v39 = vadd.f32 %v1195_v9, %v1194_v10  ;;  %v1268_v54 = vsel %vm178_vm1, %v1140_v5, 0.0  ;;  %v1143_v27 = vmul.f32 %v1500_v22, %v1427_v42  ;;  %v1282_v10 = vld [vmem:[#allocation2 + $0x4] sm:$0x1] }
 0x103   :  { %v1253_v59 = vadd.f32 %v1252_v38, %v1251_v13  ;;  %v1270_v26 = vsel %vm178_vm1, %v1141_v2, 0.0  ;;  %v1272_v3 = vsel %vm178_vm1, %v1142_v4, 0.0 }
 0x104   :  { %v1198_v53 = vadd.f32 %v1197_v14, %v1196_v39  ;;  %v1274_v46 = vsel %vm178_vm1, %v1143_v27, 0.0 }
 0x105   :  { %v1255_v12 = vadd.f32 %v1254_v33, %v1253_v59 }
 0x106   :  { %v1200_v49 = vadd.f32 %v1199_v35, %v1198_v53 }
 0x107   :  { %v1257_v34 = vadd.f32 %v1256_v23, %v1255_v12 }
 0x108   :  { %v1202_v17 = vadd.f32 %v1201_v32, %v1200_v49 }
 0x109   :  { %v1259_v36 = vadd.f32 %v1258_v51, %v1257_v34 }
 0x10a   :  { %v1204_v57 = vadd.f32 %v1203_v50, %v1202_v17 }
 0x10b   :  { %v1261_v40 = vadd.f32 %v1260_v0, %v1259_v36 }
 0x10c   :  { %v1206_v52 = vadd.f32 %v1205_v1, %v1204_v57 }
 0x10d   :  { %v1263_v19 = vadd.f32 %v1262_v47, %v1261_v40 }
 0x10e   :  { %v1207_v24 = vrot.slane %v1206_v52, 4 }
 0x10f   :  { %v1265_v25 = vadd.f32 %v1264_v55, %v1263_v19 }
 0x110   :  { %v1208_v63 = vadd.f32 %v1207_v24, %v1206_v52 }
 0x111   :  { %v1267_v43 = vadd.f32 %v1266_v16, %v1265_v25 }
 0x112   :  { %v1209_v29 = vrot.slane %v1208_v63, 2 }
 0x113   :  { %v1269_v8 = vadd.f32 %v1268_v54, %v1267_v43 }
 0x114   :  { %v1210_v48 = vadd.f32 %v1209_v29, %v1208_v63 }
 0x115   :  { %v1271_v9 = vadd.f32 %v1270_v26, %v1269_v8 }
 0x116   :  { %v1211_v60 = vrot.slane %v1210_v48, 1 }
 0x117   :  { %v1273_v58 = vadd.f32 %v1272_v3, %v1271_v9 }
 0x118   :  { %v1212_v38 = vadd.f32 %v1211_v60, %v1210_v48 }
 0x119   :  { %v1275_v41 = vadd.f32 %v1274_v46, %v1273_v58 }
 0x11a   :  { %v1284_v20 = vadd.f32 %v1282_v10, %v1212_v38 }
 0x11b   :  { %v1276_v14 = vrot.slane %v1275_v41, 4 }
 0x11c   :  { %1286 = vst.msk [vmem:[#allocation2 + $0x4] sm:$0x1] %vm321_vm2, %v1284_v20 }
 0x11d   :  { %v1277_v13 = vadd.f32 %v1276_v14, %v1275_v41 }
 0x11f   :  { %v1278_v42 = vrot.slane %v1277_v13, 2 }
 0x121   :  { %v1279_v30 = vadd.f32 %v1278_v42, %v1277_v13 }
 0x123   :  { %v1280_v39 = vrot.slane %v1279_v30, 1  ;;  %v1291_v33 = vld [vmem:[#allocation2] sm:$0x1f] }
 0x124   :  { %1294 = vst.msk [vmem:[%s4060_s2] sm:$0x1f] %vm15_vm0, %v1291_v33 }
 0x125   :  { %v1281_v21 = vadd.f32 %v1280_v39, %v1279_v30 }
 0x127   :  { %v1285_v35 = vadd.f32 %v1283_v62, %v1281_v21 }
 0x129   :  { %1287 = vst.msk [vmem:[#allocation2 + $0xc] sm:$0x1] %vm321_vm2, %v1285_v35 }
 0x130   :  { %v1292_v59 = vld [vmem:[#allocation2 + $0x8] sm:$0x1f] }
 0x131   :  { %1295 = vst.msk [vmem:[%s4060_s2 + $0x8] sm:$0x1f] %vm15_vm0, %v1292_v59 }

</bundles_post_ra>
